<compile_context>
chip_gen: v7x
topology: tpu7x:2x2x1
jax: 0.10.0
libtpu: 0.0.40
codegen_flags: <defaults>
</compile_context>

<pallas_src>
import math
import functools

import jax
import jax.numpy as jnp
from jax.experimental import pallas as pl
from jax.experimental.pallas import tpu as pltpu

LN_EPS = 1e-5          # GPT2 layer_norm_epsilon
NEG_INF = -1e9         # finite "minus infinity" for masking (safe under addition)


# ----------------------------- shared math helpers -----------------------------
def gelu_new(x):
    # GPT2 "gelu_new" (tanh approximation) -- kept in f32
    return 0.5 * x * (1.0 + jnp.tanh(math.sqrt(2.0 / math.pi) * (x + 0.044715 * x * x * x)))


def layernorm(x, g, b):
    mu = jnp.mean(x, axis=-1, keepdims=True)
    xc = x - mu
    var = jnp.mean(xc * xc, axis=-1, keepdims=True)
    return xc * jax.lax.rsqrt(var + LN_EPS) * g + b


# --------------------------- main backbone kernel --------------------------------
def transformer_layer_kernel(embeds_ref, bias_ref,
                             ln1_g_ref, ln1_b_ref, w_qkv_ref, b_qkv_ref,
                             w_ap_ref, b_ap_ref, ln2_g_ref, ln2_b_ref,
                             w_fc_ref, b_fc_ref, w_mp_ref, b_mp_ref,
                             hid_ref,
                             h_scratch,
                             *, n_head):
    l = pl.program_id(1)
    n_layer = pl.num_programs(1)

    # initialize residual stream from the token embeddings at layer 0
    @pl.when(l == 0)
    def _():
        h_scratch[...] = embeds_ref[...].astype(jnp.float32)

    h = h_scratch[...]                      # (Bt, S, D) f32
    Bt, S, D = h.shape
    hd = D // n_head
    scale = 1.0 / math.sqrt(hd)
    bf16 = jnp.bfloat16

    h2 = h.reshape(Bt * S, D)               # token-flattened residual

    # ------------------ attention sub-block ------------------
    hn = layernorm(h2, ln1_g_ref[0], ln1_b_ref[0])                      # f32
    qkv = jnp.dot(hn.astype(bf16), w_qkv_ref[0],
                  preferred_element_type=jnp.float32) + b_qkv_ref[0]    # (Bt*S, 3D) f32
    qkv = qkv.reshape(Bt, S, 3 * D)
    q = qkv[:, :, 0:D].astype(bf16)
    k = qkv[:, :, D:2 * D].astype(bf16)
    v = qkv[:, :, 2 * D:3 * D].astype(bf16)

    # causal + key-padding additive mask, built once (not per head)
    row = jax.lax.broadcasted_iota(jnp.int32, (S, S), 0)
    col = jax.lax.broadcasted_iota(jnp.int32, (S, S), 1)
    causal_add = jnp.where(col <= row, 0.0, NEG_INF)                    # (S, S)
    mask_add = causal_add[None, :, :] + bias_ref[...]                   # (Bt, S, S)

    head_outs = []
    for hh in range(n_head):
        qh = q[:, :, hh * hd:(hh + 1) * hd]
        kh = k[:, :, hh * hd:(hh + 1) * hd]
        vh = v[:, :, hh * hd:(hh + 1) * hd]
        # scores batched over the batch tile (MXU, bf16 operands, f32 accumulate)
        s = jnp.einsum('bqd,bkd->bqk', qh, kh,
                       preferred_element_type=jnp.float32) * scale + mask_add
        m = jnp.max(s, axis=-1, keepdims=True)
        e = jnp.exp(s - m)
        p = e * pl.reciprocal(jnp.sum(e, axis=-1, keepdims=True), approx=True)
        head_outs.append(jnp.einsum('bqk,bkd->bqd', p.astype(bf16), vh,
                                    preferred_element_type=jnp.float32))
    attn = jnp.concatenate(head_outs, axis=-1)                          # (Bt, S, D) f32
    attn = attn.reshape(Bt * S, D)
    attn = jnp.dot(attn.astype(bf16), w_ap_ref[0],
                   preferred_element_type=jnp.float32) + b_ap_ref[0]
    h2 = h2 + attn

    # ------------------ MLP sub-block ------------------
    hn2 = layernorm(h2, ln2_g_ref[0], ln2_b_ref[0])
    ff = jnp.dot(hn2.astype(bf16), w_fc_ref[0],
                 preferred_element_type=jnp.float32) + b_fc_ref[0]
    ff = gelu_new(ff)
    ff = jnp.dot(ff.astype(bf16), w_mp_ref[0],
                 preferred_element_type=jnp.float32) + b_mp_ref[0]
    h2 = h2 + ff

    final = h2.reshape(Bt, S, D)
    h_scratch[...] = final

    # write final hidden states on the last layer
    @pl.when(l == n_layer - 1)
    def _():
        hid_ref[...] = final.astype(hid_ref.dtype)


# ------------------------------- LM head kernel ----------------------------------
def lm_head_kernel(hid_ref, lnf_g_ref, lnf_b_ref, w_out_ref, b_out_ref,
                   out_ref, hn_scratch):
    j = pl.program_id(1)        # vocab tile index (inner axis)
    Bt, S, D = hid_ref.shape
    Vt = out_ref.shape[-1]

    # final layernorm, computed once per batch tile and cached (bf16 matmul operand)
    @pl.when(j == 0)
    def _():
        h = hid_ref[...].reshape(Bt * S, D)
        hn_scratch[...] = layernorm(h, lnf_g_ref[...], lnf_b_ref[...]).astype(jnp.bfloat16)

    logits = jnp.dot(hn_scratch[...], w_out_ref[...],
                     preferred_element_type=jnp.float32) + b_out_ref[...]
    out_ref[...] = logits.reshape(Bt, S, Vt).astype(out_ref.dtype)


# --------------------------------- wrapper ---------------------------------------
def _pick_vocab_tile(V):
    # lane-dense vocab tiling when V is 128-aligned; otherwise keep full V
    for t in (2048, 1024, 512, 256, 128):
        if V % t == 0:
            return t
    return V


def _default_vmem_limit():
    # Leave headroom below physical VMEM (128 MiB on v5e/v6e, 64 MiB on v7x).
    try:
        cap = pltpu.get_tpu_info().vmem_capacity_bytes
        return int(min(cap * 3 // 4, 100 * 1024 * 1024))
    except Exception:
        return 48 * 1024 * 1024


def transformer_forward(params, input_ids, attention_msk, *, n_head,
                        batch_tile=None, vmem_limit_bytes=None):
    wte = params['wte']
    V, D = wte.shape
    L = params['ln1_g'].shape[0]
    B, S = input_ids.shape

    Bt = B if batch_tile is None else batch_tile
    assert B % Bt == 0
    nbt = B // Bt

    Vt = _pick_vocab_tile(V)
    nvt = V // Vt

    if vmem_limit_bytes is None:
        vmem_limit_bytes = _default_vmem_limit()

    # Embedding gather (glue, stays in JAX); residual stream kept f32
    embeds = wte[input_ids].astype(jnp.float32)                          # (B, S, D)
    # HF-style additive key-padding bias, (B, 1, S) -- NOT materialized as (B,S,S)
    bias = ((1.0 - attention_msk.astype(jnp.float32)) * NEG_INF)[:, None, :]

    bf16 = jnp.bfloat16
    w_qkv = params['w_qkv'].astype(bf16)
    w_ap = params['w_attn_proj'].astype(bf16)
    w_fc = params['w_fc'].astype(bf16)
    w_mp = params['w_mlp_proj'].astype(bf16)
    w_out = params['w_out_T'].astype(bf16)

    per_batch = lambda b, l: (b, 0, 0)
    per_layer = lambda b, l: (l, 0, 0)

    layer_kernel = functools.partial(transformer_layer_kernel, n_head=n_head)

    # ---------------- backbone: (B, S, D) hidden states ----------------
    hidden = pl.pallas_call(
        layer_kernel,
        out_shape=jax.ShapeDtypeStruct((B, S, D), jnp.float32),
        grid_spec=pltpu.PrefetchScalarGridSpec(
            num_scalar_prefetch=0,
            grid=(nbt, L),                                    # layer axis innermost
            in_specs=[
                pl.BlockSpec((Bt, S, D), per_batch),          # embeds
                pl.BlockSpec((Bt, 1, S), per_batch),          # key-padding bias
                pl.BlockSpec((1, 1, D), per_layer),           # ln1_g
                pl.BlockSpec((1, 1, D), per_layer),           # ln1_b
                pl.BlockSpec((1, D, 3 * D), per_layer),       # W_qkv (bf16)
                pl.BlockSpec((1, 1, 3 * D), per_layer),       # b_qkv
                pl.BlockSpec((1, D, D), per_layer),           # W_attn_proj (bf16)
                pl.BlockSpec((1, 1, D), per_layer),           # b_attn_proj
                pl.BlockSpec((1, 1, D), per_layer),           # ln2_g
                pl.BlockSpec((1, 1, D), per_layer),           # ln2_b
                pl.BlockSpec((1, D, 4 * D), per_layer),       # W_fc (bf16)
                pl.BlockSpec((1, 1, 4 * D), per_layer),       # b_fc
                pl.BlockSpec((1, 4 * D, D), per_layer),       # W_mlp_proj (bf16)
                pl.BlockSpec((1, 1, D), per_layer),           # b_mlp_proj
            ],
            out_specs=pl.BlockSpec((Bt, S, D), per_batch),
            scratch_shapes=[pltpu.VMEM((Bt, S, D), jnp.float32)],
        ),
        compiler_params=pltpu.CompilerParams(
            dimension_semantics=("parallel", "arbitrary"),
            vmem_limit_bytes=vmem_limit_bytes),
    )(embeds, bias,
      params['ln1_g'], params['ln1_b'], w_qkv, params['b_qkv'],
      w_ap, params['b_attn_proj'], params['ln2_g'], params['ln2_b'],
      w_fc, params['b_fc'], w_mp, params['b_mlp_proj'])

    # ---------------- LM head: vocab-tiled (B, S, V) logits ----------------
    logits = pl.pallas_call(
        lm_head_kernel,
        out_shape=jax.ShapeDtypeStruct((B, S, V), jnp.float32),
        grid_spec=pltpu.PrefetchScalarGridSpec(
            num_scalar_prefetch=0,
            grid=(nbt, nvt),                                  # vocab axis innermost
            in_specs=[
                pl.BlockSpec((Bt, S, D), lambda b, j: (b, 0, 0)),   # hidden
                pl.BlockSpec((1, D), lambda b, j: (0, 0)),          # lnf_g
                pl.BlockSpec((1, D), lambda b, j: (0, 0)),          # lnf_b
                pl.BlockSpec((D, Vt), lambda b, j: (0, j)),         # W_out^T (bf16)
                pl.BlockSpec((1, Vt), lambda b, j: (0, j)),         # b_out
            ],
            out_specs=pl.BlockSpec((Bt, S, Vt), lambda b, j: (b, 0, j)),
            scratch_shapes=[pltpu.VMEM((Bt * S, D), jnp.bfloat16)],
        ),
        compiler_params=pltpu.CompilerParams(
            dimension_semantics=("parallel", "arbitrary"),
            vmem_limit_bytes=vmem_limit_bytes),
    )(hidden, params['lnf_g'], params['lnf_b'], w_out, params['b_out'])

    return logits


# --------------------------- deterministic parameter init ------------------------
def init_params(key, vocab_size, n_embd, n_layer, n_head):
    V, D, L = vocab_size, n_embd, n_layer
    std = 0.02
    ks = jax.random.split(key, 8)
    p = {
        'wte': jax.random.normal(ks[0], (V, D), jnp.float32) * std,
        'ln1_g': jnp.ones((L, 1, D), jnp.float32),
        'ln1_b': jnp.zeros((L, 1, D), jnp.float32),
        'w_qkv': jax.random.normal(ks[1], (L, D, 3 * D), jnp.float32) * std,
        'b_qkv': jax.random.normal(ks[2], (L, 1, 3 * D), jnp.float32) * std,
        'w_attn_proj': jax.random.normal(ks[3], (L, D, D), jnp.float32) * std,
        'b_attn_proj': jnp.zeros((L, 1, D), jnp.float32),
        'ln2_g': jnp.ones((L, 1, D), jnp.float32),
        'ln2_b': jnp.zeros((L, 1, D), jnp.float32),
        'w_fc': jax.random.normal(ks[4], (L, D, 4 * D), jnp.float32) * std,
        'b_fc': jax.random.normal(ks[5], (L, 1, 4 * D), jnp.float32) * std,
        'w_mlp_proj': jax.random.normal(ks[6], (L, 4 * D, D), jnp.float32) * std,
        'b_mlp_proj': jnp.zeros((L, 1, D), jnp.float32),
        'lnf_g': jnp.ones((1, D), jnp.float32),
        'lnf_b': jnp.zeros((1, D), jnp.float32),
        # nn.Linear(n_embd, vocab_size).weight is (V, D); we store the transpose
        'w_out_T': jax.random.normal(ks[7], (D, V), jnp.float32) * std,
        'b_out': jnp.zeros((1, V), jnp.float32),
    }
    return p


# --------------------------- pure-JAX f32 reference (for checking) ----------------
def reference_forward(params, input_ids, attention_msk, n_head):
    wte = params['wte']
    V, D = wte.shape
    L = params['ln1_g'].shape[0]
    B, S = input_ids.shape
    hd = D // n_head

    h = wte[input_ids].astype(jnp.float32)
    bias = (1.0 - attention_msk.astype(jnp.float32)) * NEG_INF
    bias = jnp.broadcast_to(bias[:, None, :], (B, S, S))
    causal = jnp.tril(jnp.ones((S, S), bool))

    for l in range(L):
        hn = layernorm(h, params['ln1_g'][l], params['ln1_b'][l])
        qkv = hn @ params['w_qkv'][l] + params['b_qkv'][l]
        q, k, v = qkv[..., :D], qkv[..., D:2 * D], qkv[..., 2 * D:]
        qh = q.reshape(B, S, n_head, hd).transpose(0, 2, 1, 3)
        kh = k.reshape(B, S, n_head, hd).transpose(0, 2, 1, 3)
        vh = v.reshape(B, S, n_head, hd).transpose(0, 2, 1, 3)
        s = jnp.einsum('bhqd,bhkd->bhqk', qh, kh) / math.sqrt(hd)
        s = jnp.where(causal, s, NEG_INF) + bias[:, None]
        p = jax.nn.softmax(s, axis=-1)
        o = jnp.einsum('bhqk,bhkd->bhqd', p, vh).transpose(0, 2, 1, 3).reshape(B, S, D)
        h = h + o @ params['w_attn_proj'][l] + params['b_attn_proj'][l]
        hn2 = layernorm(h, params['ln2_g'][l], params['ln2_b'][l])
        ff = gelu_new(hn2 @ params['w_fc'][l] + params['b_fc'][l])
        h = h + ff @ params['w_mlp_proj'][l] + params['b_mlp_proj'][l]

    hf = layernorm(h, params['lnf_g'], params['lnf_b'])
    return hf @ params['w_out_T'] + params['b_out']


# ------------------------------------- main ---------------------------------------
if __name__ == "__main__":
    vocab_size = 32
    n_positions = 8
    n_embd = 32
    n_layer = 2
    n_head = 4
    B, S = 2, n_positions

    key = jax.random.PRNGKey(0)
    pkey, ikey = jax.random.split(key)
    params = init_params(pkey, vocab_size, n_embd, n_layer, n_head)

    input_ids = jax.random.randint(ikey, (B, S), 0, vocab_size, dtype=jnp.int32)
    attention_msk = jnp.ones((B, S), jnp.float32).at[0, S - 1].set(0.0)

    logits = transformer_forward(params, input_ids, attention_msk, n_head=n_head)
    logits = jax.block_until_ready(logits)

    ref = reference_forward(params, input_ids, attention_msk, n_head)
    assert logits.shape == (B, S, vocab_size)
    max_err = float(jnp.max(jnp.abs(logits - ref)))
    # tolerance loosened vs. pure-f32 reference because kernel uses bf16 matmul
    # operands (f32 accumulation) and an approximate softmax reciprocal
    if max_err > 2e-2:
        raise AssertionError(f"kernel/reference mismatch, max abs err = {max_err}")

    print("KERNEL_OK")
</pallas_src>

<mosaic_0001>
module attributes {stable_mosaic.version = 11 : i64} {
  func.func @transformer_layer_kernel(%arg0: i32, %arg1: i32, %arg2: memref<2x8x32xf32, #tpu.memory_space<vmem>>, %arg3: memref<2x1x8xf32, #tpu.memory_space<vmem>>, %arg4: memref<1x1x32xf32, #tpu.memory_space<vmem>>, %arg5: memref<1x1x32xf32, #tpu.memory_space<vmem>>, %arg6: memref<1x32x96xbf16, #tpu.memory_space<vmem>>, %arg7: memref<1x1x96xf32, #tpu.memory_space<vmem>>, %arg8: memref<1x32x32xbf16, #tpu.memory_space<vmem>>, %arg9: memref<1x1x32xf32, #tpu.memory_space<vmem>>, %arg10: memref<1x1x32xf32, #tpu.memory_space<vmem>>, %arg11: memref<1x1x32xf32, #tpu.memory_space<vmem>>, %arg12: memref<1x32x128xbf16, #tpu.memory_space<vmem>>, %arg13: memref<1x1x128xf32, #tpu.memory_space<vmem>>, %arg14: memref<1x128x32xbf16, #tpu.memory_space<vmem>>, %arg15: memref<1x1x32xf32, #tpu.memory_space<vmem>>, %arg16: memref<2x8x32xf32, #tpu.memory_space<vmem>>, %arg17: memref<2x8x32xf32, #tpu.memory_space<vmem>>) attributes {dimension_semantics = [#tpu.dimension_semantics<parallel>, #tpu.dimension_semantics<arbitrary>], iteration_bounds = array<i64: 1, 2>, scalar_prefetch = 0 : i64, scratch_operands = 1 : i64, tpu.core_type = #tpu.core_type<tc>, window_params = [{transform_indices = @transform_0, window_bounds = array<i64: 2, 8, 32>}, {transform_indices = @transform_1, window_bounds = array<i64: 2, 1, 8>}, {transform_indices = @transform_2, window_bounds = array<i64: 1, 1, 32>}, {transform_indices = @transform_3, window_bounds = array<i64: 1, 1, 32>}, {transform_indices = @transform_4, window_bounds = array<i64: 1, 32, 96>}, {transform_indices = @transform_5, window_bounds = array<i64: 1, 1, 96>}, {transform_indices = @transform_6, window_bounds = array<i64: 1, 32, 32>}, {transform_indices = @transform_7, window_bounds = array<i64: 1, 1, 32>}, {transform_indices = @transform_8, window_bounds = array<i64: 1, 1, 32>}, {transform_indices = @transform_9, window_bounds = array<i64: 1, 1, 32>}, {transform_indices = @transform_10, window_bounds = array<i64: 1, 32, 128>}, {transform_indices = @transform_11, window_bounds = array<i64: 1, 1, 128>}, {transform_indices = @transform_12, window_bounds = array<i64: 1, 128, 32>}, {transform_indices = @transform_13, window_bounds = array<i64: 1, 1, 32>}, {transform_indices = @transform_14, window_bounds = array<i64: 2, 8, 32>}]} {
    %c0_i32 = arith.constant 0 : i32
    %0 = arith.cmpi eq, %arg1, %c0_i32 : i32
    %1 = arith.extui %0 : i1 to i32
    %c0_i32_0 = arith.constant 0 : i32
    %2 = arith.cmpi ne, %1, %c0_i32_0 : i32
    scf.if %2 {
      %c0_85 = arith.constant 0 : index
      %c0_86 = arith.constant 0 : index
      %c0_87 = arith.constant 0 : index
      %201 = vector.load %arg2[%c0_85, %c0_86, %c0_87] : memref<2x8x32xf32, #tpu.memory_space<vmem>>, vector<2x8x32xf32>
      %c0_88 = arith.constant 0 : index
      %c0_89 = arith.constant 0 : index
      %c0_90 = arith.constant 0 : index
      %202 = vector.load %arg17[%c0_88, %c0_89, %c0_90] : memref<2x8x32xf32, #tpu.memory_space<vmem>>, vector<2x8x32xf32>
      tpu.vector_store %arg17[%c0_88, %c0_89, %c0_90], %201 {strides = array<i32>} : memref<2x8x32xf32, #tpu.memory_space<vmem>>, vector<2x8x32xf32>,
    } else {
    }
    %c0 = arith.constant 0 : index
    %c0_1 = arith.constant 0 : index
    %c0_2 = arith.constant 0 : index
    %3 = vector.load %arg17[%c0, %c0_1, %c0_2] : memref<2x8x32xf32, #tpu.memory_space<vmem>>, vector<2x8x32xf32>
    %4 = vector.shape_cast %3 : vector<2x8x32xf32> to vector<16x32xf32>
    %c0_3 = arith.constant 0 : index
    %c0_4 = arith.constant 0 : index
    %c0_5 = arith.constant 0 : index
    %5 = vector.load %arg4[%c0_3, %c0_4, %c0_5] : memref<1x1x32xf32, #tpu.memory_space<vmem>>, vector<1x1x32xf32>
    %6 = vector.shape_cast %5 : vector<1x1x32xf32> to vector<1x32xf32>
    %c0_6 = arith.constant 0 : index
    %c0_7 = arith.constant 0 : index
    %c0_8 = arith.constant 0 : index
    %7 = vector.load %arg5[%c0_6, %c0_7, %c0_8] : memref<1x1x32xf32, #tpu.memory_space<vmem>>, vector<1x1x32xf32>
    %8 = vector.shape_cast %7 : vector<1x1x32xf32> to vector<1x32xf32>
    %cst = arith.constant dense<0.000000e+00> : vector<16xf32>
    %9 = vector.multi_reduction <add>, %4, %cst [1] : vector<16x32xf32> to vector<16xf32>
    %10 = vector.shape_cast %9 : vector<16xf32> to vector<16x1xf32>
    %cst_9 = arith.constant 3.200000e+01 : f32
    %11 = vector.broadcast %cst_9 : f32 to vector<16x1xf32>
    %12 = arith.divf %10, %11 : vector<16x1xf32>
    %13 = vector.broadcast %12 : vector<16x1xf32> to vector<16x32xf32>
    %14 = arith.subf %4, %13 : vector<16x32xf32>
    %15 = arith.mulf %14, %14 : vector<16x32xf32>
    %cst_10 = arith.constant dense<0.000000e+00> : vector<16xf32>
    %16 = vector.multi_reduction <add>, %15, %cst_10 [1] : vector<16x32xf32> to vector<16xf32>
    %17 = vector.shape_cast %16 : vector<16xf32> to vector<16x1xf32>
    %cst_11 = arith.constant 3.200000e+01 : f32
    %18 = vector.broadcast %cst_11 : f32 to vector<16x1xf32>
    %19 = arith.divf %17, %18 : vector<16x1xf32>
    %cst_12 = arith.constant 9.99999974E-6 : f32
    %20 = vector.broadcast %cst_12 : f32 to vector<16x1xf32>
    %21 = arith.addf %19, %20 : vector<16x1xf32>
    %22 = math.rsqrt %21 : vector<16x1xf32>
    %23 = vector.broadcast %22 : vector<16x1xf32> to vector<16x32xf32>
    %24 = arith.mulf %14, %23 : vector<16x32xf32>
    %25 = vector.broadcast %6 : vector<1x32xf32> to vector<16x32xf32>
    %26 = arith.mulf %24, %25 : vector<16x32xf32>
    %27 = vector.broadcast %8 : vector<1x32xf32> to vector<16x32xf32>
    %28 = arith.addf %26, %27 : vector<16x32xf32>
    %29 = arith.truncf %28 : vector<16x32xf32> to vector<16x32xbf16>
    %c0_13 = arith.constant 0 : index
    %c0_14 = arith.constant 0 : index
    %c0_15 = arith.constant 0 : index
    %30 = vector.load %arg6[%c0_13, %c0_14, %c0_15] : memref<1x32x96xbf16, #tpu.memory_space<vmem>>, vector<1x32x96xbf16>
    %31 = vector.shape_cast %30 : vector<1x32x96xbf16> to vector<32x96xbf16>
    %cst_16 = arith.constant dense<0.000000e+00> : vector<16x96xf32>
    %32 = tpu.matmul %29, %31, %cst_16 {dimension_numbers = #tpu.dot_dimension_numbers<[1], [0], [0], [1], [0, 0, 1, 1], [], []>} : vector<16x32xbf16>, vector<32x96xbf16>, vector<16x96xf32> -> vector<16x96xf32>
    %c0_17 = arith.constant 0 : index
    %c0_18 = arith.constant 0 : index
    %c0_19 = arith.constant 0 : index
    %33 = vector.load %arg7[%c0_17, %c0_18, %c0_19] : memref<1x1x96xf32, #tpu.memory_space<vmem>>, vector<1x1x96xf32>
    %34 = vector.shape_cast %33 : vector<1x1x96xf32> to vector<1x96xf32>
    %35 = vector.broadcast %34 : vector<1x96xf32> to vector<16x96xf32>
    %36 = arith.addf %32, %35 : vector<16x96xf32>
    %37 = vector.shape_cast %36 : vector<16x96xf32> to vector<2x8x96xf32>
    %38 = vector.extract_strided_slice %37 {offsets = [0, 0, 0], sizes = [2, 8, 32], strides = [1, 1, 1]} : vector<2x8x96xf32> to vector<2x8x32xf32>
    %39 = arith.truncf %38 : vector<2x8x32xf32> to vector<2x8x32xbf16>
    %40 = vector.extract_strided_slice %37 {offsets = [0, 0, 32], sizes = [2, 8, 32], strides = [1, 1, 1]} : vector<2x8x96xf32> to vector<2x8x32xf32>
    %41 = arith.truncf %40 : vector<2x8x32xf32> to vector<2x8x32xbf16>
    %42 = vector.extract_strided_slice %37 {offsets = [0, 0, 64], sizes = [2, 8, 32], strides = [1, 1, 1]} : vector<2x8x96xf32> to vector<2x8x32xf32>
    %43 = arith.truncf %42 : vector<2x8x32xf32> to vector<2x8x32xbf16>
    %44 = tpu.iota {dimensions = array<i32: 0>} : vector<8x8xi32>
    %45 = tpu.iota {dimensions = array<i32: 1>} : vector<8x8xi32>
    %46 = arith.cmpi sle, %45, %44 : vector<8x8xi32>
    %cst_20 = arith.constant 0.000000e+00 : f32
    %cst_21 = arith.constant -1.000000e+09 : f32
    %47 = vector.broadcast %cst_20 : f32 to vector<8x8xf32>
    %48 = vector.broadcast %cst_21 : f32 to vector<8x8xf32>
    %49 = arith.select %46, %47, %48 : vector<8x8xi1>, vector<8x8xf32>
    %50 = vector.shape_cast %49 : vector<8x8xf32> to vector<1x8x8xf32>
    %c0_22 = arith.constant 0 : index
    %c0_23 = arith.constant 0 : index
    %c0_24 = arith.constant 0 : index
    %51 = vector.load %arg3[%c0_22, %c0_23, %c0_24] : memref<2x1x8xf32, #tpu.memory_space<vmem>>, vector<2x1x8xf32>
    %52 = vector.broadcast %50 : vector<1x8x8xf32> to vector<2x8x8xf32>
    %53 = vector.broadcast %51 : vector<2x1x8xf32> to vector<2x8x8xf32>
    %54 = arith.addf %52, %53 : vector<2x8x8xf32>
    %55 = vector.extract_strided_slice %39 {offsets = [0, 0, 0], sizes = [2, 8, 8], strides = [1, 1, 1]} : vector<2x8x32xbf16> to vector<2x8x8xbf16>
    %56 = vector.extract_strided_slice %41 {offsets = [0, 0, 0], sizes = [2, 8, 8], strides = [1, 1, 1]} : vector<2x8x32xbf16> to vector<2x8x8xbf16>
    %57 = vector.extract_strided_slice %43 {offsets = [0, 0, 0], sizes = [2, 8, 8], strides = [1, 1, 1]} : vector<2x8x32xbf16> to vector<2x8x8xbf16>
    "tpu.trace_start"() <{level = 10 : i32, message = "bqd,bkd->bqk"}> : () -> ()
    %cst_25 = arith.constant dense<0.000000e+00> : vector<2x8x8xf32>
    %58 = tpu.matmul %55, %56, %cst_25 {dimension_numbers = #tpu.dot_dimension_numbers<[2], [2], [1], [1], [0, 0, 0, 1, 1, 1], [0], [0]>} : vector<2x8x8xbf16>, vector<2x8x8xbf16>, vector<2x8x8xf32> -> vector<2x8x8xf32>
    "tpu.trace_stop"() : () -> ()
    %cst_26 = arith.constant 0.353553385 : f32
    %59 = vector.broadcast %cst_26 : f32 to vector<2x8x8xf32>
    %60 = arith.mulf %58, %59 : vector<2x8x8xf32>
    %61 = arith.addf %60, %54 : vector<2x8x8xf32>
    %cst_27 = arith.constant dense<0xFF800000> : vector<2x8xf32>
    %62 = vector.multi_reduction <maximumf>, %61, %cst_27 [2] : vector<2x8x8xf32> to vector<2x8xf32>
    %63 = vector.shape_cast %62 : vector<2x8xf32> to vector<2x8x1xf32>
    %64 = vector.broadcast %63 : vector<2x8x1xf32> to vector<2x8x8xf32>
    %65 = arith.subf %61, %64 : vector<2x8x8xf32>
    %66 = math.exp %65 : vector<2x8x8xf32>
    %cst_28 = arith.constant dense<0.000000e+00> : vector<2x8xf32>
    %67 = vector.multi_reduction <add>, %66, %cst_28 [2] : vector<2x8x8xf32> to vector<2x8xf32>
    %68 = vector.shape_cast %67 : vector<2x8xf32> to vector<2x8x1xf32>
    %69 = tpu.reciprocal %68 {approx = true} : vector<2x8x1xf32> -> vector<2x8x1xf32>
    %70 = vector.broadcast %69 : vector<2x8x1xf32> to vector<2x8x8xf32>
    %71 = arith.mulf %66, %70 : vector<2x8x8xf32>
    %72 = arith.truncf %71 : vector<2x8x8xf32> to vector<2x8x8xbf16>
    "tpu.trace_start"() <{level = 10 : i32, message = "bqk,bkd->bqd"}> : () -> ()
    %cst_29 = arith.constant dense<0.000000e+00> : vector<2x8x8xf32>
    %73 = tpu.matmul %72, %57, %cst_29 {dimension_numbers = #tpu.dot_dimension_numbers<[2], [1], [1], [2], [0, 0, 0, 1, 1, 2], [0], [0]>} : vector<2x8x8xbf16>, vector<2x8x8xbf16>, vector<2x8x8xf32> -> vector<2x8x8xf32>
    "tpu.trace_stop"() : () -> ()
    %74 = vector.extract_strided_slice %39 {offsets = [0, 0, 8], sizes = [2, 8, 8], strides = [1, 1, 1]} : vector<2x8x32xbf16> to vector<2x8x8xbf16>
    %75 = vector.extract_strided_slice %41 {offsets = [0, 0, 8], sizes = [2, 8, 8], strides = [1, 1, 1]} : vector<2x8x32xbf16> to vector<2x8x8xbf16>
    %76 = vector.extract_strided_slice %43 {offsets = [0, 0, 8], sizes = [2, 8, 8], strides = [1, 1, 1]} : vector<2x8x32xbf16> to vector<2x8x8xbf16>
    "tpu.trace_start"() <{level = 10 : i32, message = "bqd,bkd->bqk"}> : () -> ()
    %cst_30 = arith.constant dense<0.000000e+00> : vector<2x8x8xf32>
    %77 = tpu.matmul %74, %75, %cst_30 {dimension_numbers = #tpu.dot_dimension_numbers<[2], [2], [1], [1], [0, 0, 0, 1, 1, 1], [0], [0]>} : vector<2x8x8xbf16>, vector<2x8x8xbf16>, vector<2x8x8xf32> -> vector<2x8x8xf32>
    "tpu.trace_stop"() : () -> ()
    %cst_31 = arith.constant 0.353553385 : f32
    %78 = vector.broadcast %cst_31 : f32 to vector<2x8x8xf32>
    %79 = arith.mulf %77, %78 : vector<2x8x8xf32>
    %80 = arith.addf %79, %54 : vector<2x8x8xf32>
    %cst_32 = arith.constant dense<0xFF800000> : vector<2x8xf32>
    %81 = vector.multi_reduction <maximumf>, %80, %cst_32 [2] : vector<2x8x8xf32> to vector<2x8xf32>
    %82 = vector.shape_cast %81 : vector<2x8xf32> to vector<2x8x1xf32>
    %83 = vector.broadcast %82 : vector<2x8x1xf32> to vector<2x8x8xf32>
    %84 = arith.subf %80, %83 : vector<2x8x8xf32>
    %85 = math.exp %84 : vector<2x8x8xf32>
    %cst_33 = arith.constant dense<0.000000e+00> : vector<2x8xf32>
    %86 = vector.multi_reduction <add>, %85, %cst_33 [2] : vector<2x8x8xf32> to vector<2x8xf32>
    %87 = vector.shape_cast %86 : vector<2x8xf32> to vector<2x8x1xf32>
    %88 = tpu.reciprocal %87 {approx = true} : vector<2x8x1xf32> -> vector<2x8x1xf32>
    %89 = vector.broadcast %88 : vector<2x8x1xf32> to vector<2x8x8xf32>
    %90 = arith.mulf %85, %89 : vector<2x8x8xf32>
    %91 = arith.truncf %90 : vector<2x8x8xf32> to vector<2x8x8xbf16>
    "tpu.trace_start"() <{level = 10 : i32, message = "bqk,bkd->bqd"}> : () -> ()
    %cst_34 = arith.constant dense<0.000000e+00> : vector<2x8x8xf32>
    %92 = tpu.matmul %91, %76, %cst_34 {dimension_numbers = #tpu.dot_dimension_numbers<[2], [1], [1], [2], [0, 0, 0, 1, 1, 2], [0], [0]>} : vector<2x8x8xbf16>, vector<2x8x8xbf16>, vector<2x8x8xf32> -> vector<2x8x8xf32>
    "tpu.trace_stop"() : () -> ()
    %93 = vector.extract_strided_slice %39 {offsets = [0, 0, 16], sizes = [2, 8, 8], strides = [1, 1, 1]} : vector<2x8x32xbf16> to vector<2x8x8xbf16>
    %94 = vector.extract_strided_slice %41 {offsets = [0, 0, 16], sizes = [2, 8, 8], strides = [1, 1, 1]} : vector<2x8x32xbf16> to vector<2x8x8xbf16>
    %95 = vector.extract_strided_slice %43 {offsets = [0, 0, 16], sizes = [2, 8, 8], strides = [1, 1, 1]} : vector<2x8x32xbf16> to vector<2x8x8xbf16>
    "tpu.trace_start"() <{level = 10 : i32, message = "bqd,bkd->bqk"}> : () -> ()
    %cst_35 = arith.constant dense<0.000000e+00> : vector<2x8x8xf32>
    %96 = tpu.matmul %93, %94, %cst_35 {dimension_numbers = #tpu.dot_dimension_numbers<[2], [2], [1], [1], [0, 0, 0, 1, 1, 1], [0], [0]>} : vector<2x8x8xbf16>, vector<2x8x8xbf16>, vector<2x8x8xf32> -> vector<2x8x8xf32>
    "tpu.trace_stop"() : () -> ()
    %cst_36 = arith.constant 0.353553385 : f32
    %97 = vector.broadcast %cst_36 : f32 to vector<2x8x8xf32>
    %98 = arith.mulf %96, %97 : vector<2x8x8xf32>
    %99 = arith.addf %98, %54 : vector<2x8x8xf32>
    %cst_37 = arith.constant dense<0xFF800000> : vector<2x8xf32>
    %100 = vector.multi_reduction <maximumf>, %99, %cst_37 [2] : vector<2x8x8xf32> to vector<2x8xf32>
    %101 = vector.shape_cast %100 : vector<2x8xf32> to vector<2x8x1xf32>
    %102 = vector.broadcast %101 : vector<2x8x1xf32> to vector<2x8x8xf32>
    %103 = arith.subf %99, %102 : vector<2x8x8xf32>
    %104 = math.exp %103 : vector<2x8x8xf32>
    %cst_38 = arith.constant dense<0.000000e+00> : vector<2x8xf32>
    %105 = vector.multi_reduction <add>, %104, %cst_38 [2] : vector<2x8x8xf32> to vector<2x8xf32>
    %106 = vector.shape_cast %105 : vector<2x8xf32> to vector<2x8x1xf32>
    %107 = tpu.reciprocal %106 {approx = true} : vector<2x8x1xf32> -> vector<2x8x1xf32>
    %108 = vector.broadcast %107 : vector<2x8x1xf32> to vector<2x8x8xf32>
    %109 = arith.mulf %104, %108 : vector<2x8x8xf32>
    %110 = arith.truncf %109 : vector<2x8x8xf32> to vector<2x8x8xbf16>
    "tpu.trace_start"() <{level = 10 : i32, message = "bqk,bkd->bqd"}> : () -> ()
    %cst_39 = arith.constant dense<0.000000e+00> : vector<2x8x8xf32>
    %111 = tpu.matmul %110, %95, %cst_39 {dimension_numbers = #tpu.dot_dimension_numbers<[2], [1], [1], [2], [0, 0, 0, 1, 1, 2], [0], [0]>} : vector<2x8x8xbf16>, vector<2x8x8xbf16>, vector<2x8x8xf32> -> vector<2x8x8xf32>
    "tpu.trace_stop"() : () -> ()
    %112 = vector.extract_strided_slice %39 {offsets = [0, 0, 24], sizes = [2, 8, 8], strides = [1, 1, 1]} : vector<2x8x32xbf16> to vector<2x8x8xbf16>
    %113 = vector.extract_strided_slice %41 {offsets = [0, 0, 24], sizes = [2, 8, 8], strides = [1, 1, 1]} : vector<2x8x32xbf16> to vector<2x8x8xbf16>
    %114 = vector.extract_strided_slice %43 {offsets = [0, 0, 24], sizes = [2, 8, 8], strides = [1, 1, 1]} : vector<2x8x32xbf16> to vector<2x8x8xbf16>
    "tpu.trace_start"() <{level = 10 : i32, message = "bqd,bkd->bqk"}> : () -> ()
    %cst_40 = arith.constant dense<0.000000e+00> : vector<2x8x8xf32>
    %115 = tpu.matmul %112, %113, %cst_40 {dimension_numbers = #tpu.dot_dimension_numbers<[2], [2], [1], [1], [0, 0, 0, 1, 1, 1], [0], [0]>} : vector<2x8x8xbf16>, vector<2x8x8xbf16>, vector<2x8x8xf32> -> vector<2x8x8xf32>
    "tpu.trace_stop"() : () -> ()
    %cst_41 = arith.constant 0.353553385 : f32
    %116 = vector.broadcast %cst_41 : f32 to vector<2x8x8xf32>
    %117 = arith.mulf %115, %116 : vector<2x8x8xf32>
    %118 = arith.addf %117, %54 : vector<2x8x8xf32>
    %cst_42 = arith.constant dense<0xFF800000> : vector<2x8xf32>
    %119 = vector.multi_reduction <maximumf>, %118, %cst_42 [2] : vector<2x8x8xf32> to vector<2x8xf32>
    %120 = vector.shape_cast %119 : vector<2x8xf32> to vector<2x8x1xf32>
    %121 = vector.broadcast %120 : vector<2x8x1xf32> to vector<2x8x8xf32>
    %122 = arith.subf %118, %121 : vector<2x8x8xf32>
    %123 = math.exp %122 : vector<2x8x8xf32>
    %cst_43 = arith.constant dense<0.000000e+00> : vector<2x8xf32>
    %124 = vector.multi_reduction <add>, %123, %cst_43 [2] : vector<2x8x8xf32> to vector<2x8xf32>
    %125 = vector.shape_cast %124 : vector<2x8xf32> to vector<2x8x1xf32>
    %126 = tpu.reciprocal %125 {approx = true} : vector<2x8x1xf32> -> vector<2x8x1xf32>
    %127 = vector.broadcast %126 : vector<2x8x1xf32> to vector<2x8x8xf32>
    %128 = arith.mulf %123, %127 : vector<2x8x8xf32>
    %129 = arith.truncf %128 : vector<2x8x8xf32> to vector<2x8x8xbf16>
    "tpu.trace_start"() <{level = 10 : i32, message = "bqk,bkd->bqd"}> : () -> ()
    %cst_44 = arith.constant dense<0.000000e+00> : vector<2x8x8xf32>
    %130 = tpu.matmul %129, %114, %cst_44 {dimension_numbers = #tpu.dot_dimension_numbers<[2], [1], [1], [2], [0, 0, 0, 1, 1, 2], [0], [0]>} : vector<2x8x8xbf16>, vector<2x8x8xbf16>, vector<2x8x8xf32> -> vector<2x8x8xf32>
    "tpu.trace_stop"() : () -> ()
    %131 = tpu.concatenate %73, %92, %111, %130 in 2 : vector<2x8x8xf32>, vector<2x8x8xf32>, vector<2x8x8xf32>, vector<2x8x8xf32> -> vector<2x8x32xf32>
    %132 = vector.shape_cast %131 : vector<2x8x32xf32> to vector<16x32xf32>
    %133 = arith.truncf %132 : vector<16x32xf32> to vector<16x32xbf16>
    %c0_45 = arith.constant 0 : index
    %c0_46 = arith.constant 0 : index
    %c0_47 = arith.constant 0 : index
    %134 = vector.load %arg8[%c0_45, %c0_46, %c0_47] : memref<1x32x32xbf16, #tpu.memory_space<vmem>>, vector<1x32x32xbf16>
    %135 = vector.shape_cast %134 : vector<1x32x32xbf16> to vector<32x32xbf16>
    %cst_48 = arith.constant dense<0.000000e+00> : vector<16x32xf32>
    %136 = tpu.matmul %133, %135, %cst_48 {dimension_numbers = #tpu.dot_dimension_numbers<[1], [0], [0], [1], [0, 0, 1, 1], [], []>} : vector<16x32xbf16>, vector<32x32xbf16>, vector<16x32xf32> -> vector<16x32xf32>
    %c0_49 = arith.constant 0 : index
    %c0_50 = arith.constant 0 : index
    %c0_51 = arith.constant 0 : index
    %137 = vector.load %arg9[%c0_49, %c0_50, %c0_51] : memref<1x1x32xf32, #tpu.memory_space<vmem>>, vector<1x1x32xf32>
    %138 = vector.shape_cast %137 : vector<1x1x32xf32> to vector<1x32xf32>
    %139 = vector.broadcast %138 : vector<1x32xf32> to vector<16x32xf32>
    %140 = arith.addf %136, %139 : vector<16x32xf32>
    %141 = arith.addf %4, %140 : vector<16x32xf32>
    %c0_52 = arith.constant 0 : index
    %c0_53 = arith.constant 0 : index
    %c0_54 = arith.constant 0 : index
    %142 = vector.load %arg10[%c0_52, %c0_53, %c0_54] : memref<1x1x32xf32, #tpu.memory_space<vmem>>, vector<1x1x32xf32>
    %143 = vector.shape_cast %142 : vector<1x1x32xf32> to vector<1x32xf32>
    %c0_55 = arith.constant 0 : index
    %c0_56 = arith.constant 0 : index
    %c0_57 = arith.constant 0 : index
    %144 = vector.load %arg11[%c0_55, %c0_56, %c0_57] : memref<1x1x32xf32, #tpu.memory_space<vmem>>, vector<1x1x32xf32>
    %145 = vector.shape_cast %144 : vector<1x1x32xf32> to vector<1x32xf32>
    %cst_58 = arith.constant dense<0.000000e+00> : vector<16xf32>
    %146 = vector.multi_reduction <add>, %141, %cst_58 [1] : vector<16x32xf32> to vector<16xf32>
    %147 = vector.shape_cast %146 : vector<16xf32> to vector<16x1xf32>
    %cst_59 = arith.constant 3.200000e+01 : f32
    %148 = vector.broadcast %cst_59 : f32 to vector<16x1xf32>
    %149 = arith.divf %147, %148 : vector<16x1xf32>
    %150 = vector.broadcast %149 : vector<16x1xf32> to vector<16x32xf32>
    %151 = arith.subf %141, %150 : vector<16x32xf32>
    %152 = arith.mulf %151, %151 : vector<16x32xf32>
    %cst_60 = arith.constant dense<0.000000e+00> : vector<16xf32>
    %153 = vector.multi_reduction <add>, %152, %cst_60 [1] : vector<16x32xf32> to vector<16xf32>
    %154 = vector.shape_cast %153 : vector<16xf32> to vector<16x1xf32>
    %cst_61 = arith.constant 3.200000e+01 : f32
    %155 = vector.broadcast %cst_61 : f32 to vector<16x1xf32>
    %156 = arith.divf %154, %155 : vector<16x1xf32>
    %cst_62 = arith.constant 9.99999974E-6 : f32
    %157 = vector.broadcast %cst_62 : f32 to vector<16x1xf32>
    %158 = arith.addf %156, %157 : vector<16x1xf32>
    %159 = math.rsqrt %158 : vector<16x1xf32>
    %160 = vector.broadcast %159 : vector<16x1xf32> to vector<16x32xf32>
    %161 = arith.mulf %151, %160 : vector<16x32xf32>
    %162 = vector.broadcast %143 : vector<1x32xf32> to vector<16x32xf32>
    %163 = arith.mulf %161, %162 : vector<16x32xf32>
    %164 = vector.broadcast %145 : vector<1x32xf32> to vector<16x32xf32>
    %165 = arith.addf %163, %164 : vector<16x32xf32>
    %166 = arith.truncf %165 : vector<16x32xf32> to vector<16x32xbf16>
    %c0_63 = arith.constant 0 : index
    %c0_64 = arith.constant 0 : index
    %c0_65 = arith.constant 0 : index
    %167 = vector.load %arg12[%c0_63, %c0_64, %c0_65] : memref<1x32x128xbf16, #tpu.memory_space<vmem>>, vector<1x32x128xbf16>
    %168 = vector.shape_cast %167 : vector<1x32x128xbf16> to vector<32x128xbf16>
    %cst_66 = arith.constant dense<0.000000e+00> : vector<16x128xf32>
    %169 = tpu.matmul %166, %168, %cst_66 {dimension_numbers = #tpu.dot_dimension_numbers<[1], [0], [0], [1], [0, 0, 1, 1], [], []>} : vector<16x32xbf16>, vector<32x128xbf16>, vector<16x128xf32> -> vector<16x128xf32>
    %c0_67 = arith.constant 0 : index
    %c0_68 = arith.constant 0 : index
    %c0_69 = arith.constant 0 : index
    %170 = vector.load %arg13[%c0_67, %c0_68, %c0_69] : memref<1x1x128xf32, #tpu.memory_space<vmem>>, vector<1x1x128xf32>
    %171 = vector.shape_cast %170 : vector<1x1x128xf32> to vector<1x128xf32>
    %172 = vector.broadcast %171 : vector<1x128xf32> to vector<16x128xf32>
    %173 = arith.addf %169, %172 : vector<16x128xf32>
    %cst_70 = arith.constant 5.000000e-01 : f32
    %174 = vector.broadcast %cst_70 : f32 to vector<16x128xf32>
    %175 = arith.mulf %174, %173 : vector<16x128xf32>
    %cst_71 = arith.constant 4.471500e-02 : f32
    %176 = vector.broadcast %cst_71 : f32 to vector<16x128xf32>
    %177 = arith.mulf %176, %173 : vector<16x128xf32>
    %178 = arith.mulf %177, %173 : vector<16x128xf32>
    %179 = arith.mulf %178, %173 : vector<16x128xf32>
    %180 = arith.addf %173, %179 : vector<16x128xf32>
    %cst_72 = arith.constant 0.797884583 : f32
    %181 = vector.broadcast %cst_72 : f32 to vector<16x128xf32>
    %182 = arith.mulf %181, %180 : vector<16x128xf32>
    %183 = math.tanh %182 : vector<16x128xf32>
    %cst_73 = arith.constant 1.000000e+00 : f32
    %184 = vector.broadcast %cst_73 : f32 to vector<16x128xf32>
    %185 = arith.addf %184, %183 : vector<16x128xf32>
    %186 = arith.mulf %175, %185 : vector<16x128xf32>
    %187 = arith.truncf %186 : vector<16x128xf32> to vector<16x128xbf16>
    %c0_74 = arith.constant 0 : index
    %c0_75 = arith.constant 0 : index
    %c0_76 = arith.constant 0 : index
    %188 = vector.load %arg14[%c0_74, %c0_75, %c0_76] : memref<1x128x32xbf16, #tpu.memory_space<vmem>>, vector<1x128x32xbf16>
    %189 = vector.shape_cast %188 : vector<1x128x32xbf16> to vector<128x32xbf16>
    %cst_77 = arith.constant dense<0.000000e+00> : vector<16x32xf32>
    %190 = tpu.matmul %187, %189, %cst_77 {dimension_numbers = #tpu.dot_dimension_numbers<[1], [0], [0], [1], [0, 0, 1, 1], [], []>} : vector<16x128xbf16>, vector<128x32xbf16>, vector<16x32xf32> -> vector<16x32xf32>
    %c0_78 = arith.constant 0 : index
    %c0_79 = arith.constant 0 : index
    %c0_80 = arith.constant 0 : index
    %191 = vector.load %arg15[%c0_78, %c0_79, %c0_80] : memref<1x1x32xf32, #tpu.memory_space<vmem>>, vector<1x1x32xf32>
    %192 = vector.shape_cast %191 : vector<1x1x32xf32> to vector<1x32xf32>
    %193 = vector.broadcast %192 : vector<1x32xf32> to vector<16x32xf32>
    %194 = arith.addf %190, %193 : vector<16x32xf32>
    %195 = arith.addf %141, %194 : vector<16x32xf32>
    %196 = vector.shape_cast %195 : vector<16x32xf32> to vector<2x8x32xf32>
    %c0_81 = arith.constant 0 : index
    %c0_82 = arith.constant 0 : index
    %c0_83 = arith.constant 0 : index
    %197 = vector.load %arg17[%c0_81, %c0_82, %c0_83] : memref<2x8x32xf32, #tpu.memory_space<vmem>>, vector<2x8x32xf32>
    tpu.vector_store %arg17[%c0_81, %c0_82, %c0_83], %196 {strides = array<i32>} : memref<2x8x32xf32, #tpu.memory_space<vmem>>, vector<2x8x32xf32>,
    %c1_i32 = arith.constant 1 : i32
    %198 = arith.cmpi eq, %arg1, %c1_i32 : i32
    %199 = arith.extui %198 : i1 to i32
    %c0_i32_84 = arith.constant 0 : i32
    %200 = arith.cmpi ne, %199, %c0_i32_84 : i32
    scf.if %200 {
      %c0_85 = arith.constant 0 : index
      %c0_86 = arith.constant 0 : index
      %c0_87 = arith.constant 0 : index
      %201 = vector.load %arg16[%c0_85, %c0_86, %c0_87] : memref<2x8x32xf32, #tpu.memory_space<vmem>>, vector<2x8x32xf32>
      tpu.vector_store %arg16[%c0_85, %c0_86, %c0_87], %196 {strides = array<i32>} : memref<2x8x32xf32, #tpu.memory_space<vmem>>, vector<2x8x32xf32>,
    } else {
    }
    return
  }
  func.func @transform_0(%arg0: i32, %arg1: i32) -> (i32, i32, i32) {
    %c0_i32 = arith.constant 0 : i32
    %c0_i32_0 = arith.constant 0 : i32
    %c0_i32_1 = arith.constant 0 : i32
    return %arg0, %c0_i32, %c0_i32_0 : i32, i32, i32
  }
  func.func @transform_1(%arg0: i32, %arg1: i32) -> (i32, i32, i32) {
    %c0_i32 = arith.constant 0 : i32
    %c0_i32_0 = arith.constant 0 : i32
    %c0_i32_1 = arith.constant 0 : i32
    return %arg0, %c0_i32, %c0_i32_0 : i32, i32, i32
  }
  func.func @transform_2(%arg0: i32, %arg1: i32) -> (i32, i32, i32) {
    %c0_i32 = arith.constant 0 : i32
    %c0_i32_0 = arith.constant 0 : i32
    %c0_i32_1 = arith.constant 0 : i32
    return %arg1, %c0_i32, %c0_i32_0 : i32, i32, i32
  }
  func.func @transform_3(%arg0: i32, %arg1: i32) -> (i32, i32, i32) {
    %c0_i32 = arith.constant 0 : i32
    %c0_i32_0 = arith.constant 0 : i32
    %c0_i32_1 = arith.constant 0 : i32
    return %arg1, %c0_i32, %c0_i32_0 : i32, i32, i32
  }
  func.func @transform_4(%arg0: i32, %arg1: i32) -> (i32, i32, i32) {
    %c0_i32 = arith.constant 0 : i32
    %c0_i32_0 = arith.constant 0 : i32
    %c0_i32_1 = arith.constant 0 : i32
    return %arg1, %c0_i32, %c0_i32_0 : i32, i32, i32
  }
  func.func @transform_5(%arg0: i32, %arg1: i32) -> (i32, i32, i32) {
    %c0_i32 = arith.constant 0 : i32
    %c0_i32_0 = arith.constant 0 : i32
    %c0_i32_1 = arith.constant 0 : i32
    return %arg1, %c0_i32, %c0_i32_0 : i32, i32, i32
  }
  func.func @transform_6(%arg0: i32, %arg1: i32) -> (i32, i32, i32) {
    %c0_i32 = arith.constant 0 : i32
    %c0_i32_0 = arith.constant 0 : i32
    %c0_i32_1 = arith.constant 0 : i32
    return %arg1, %c0_i32, %c0_i32_0 : i32, i32, i32
  }
  func.func @transform_7(%arg0: i32, %arg1: i32) -> (i32, i32, i32) {
    %c0_i32 = arith.constant 0 : i32
    %c0_i32_0 = arith.constant 0 : i32
    %c0_i32_1 = arith.constant 0 : i32
    return %arg1, %c0_i32, %c0_i32_0 : i32, i32, i32
  }
  func.func @transform_8(%arg0: i32, %arg1: i32) -> (i32, i32, i32) {
    %c0_i32 = arith.constant 0 : i32
    %c0_i32_0 = arith.constant 0 : i32
    %c0_i32_1 = arith.constant 0 : i32
    return %arg1, %c0_i32, %c0_i32_0 : i32, i32, i32
  }
  func.func @transform_9(%arg0: i32, %arg1: i32) -> (i32, i32, i32) {
    %c0_i32 = arith.constant 0 : i32
    %c0_i32_0 = arith.constant 0 : i32
    %c0_i32_1 = arith.constant 0 : i32
    return %arg1, %c0_i32, %c0_i32_0 : i32, i32, i32
  }
  func.func @transform_10(%arg0: i32, %arg1: i32) -> (i32, i32, i32) {
    %c0_i32 = arith.constant 0 : i32
    %c0_i32_0 = arith.constant 0 : i32
    %c0_i32_1 = arith.constant 0 : i32
    return %arg1, %c0_i32, %c0_i32_0 : i32, i32, i32
  }
  func.func @transform_11(%arg0: i32, %arg1: i32) -> (i32, i32, i32) {
    %c0_i32 = arith.constant 0 : i32
    %c0_i32_0 = arith.constant 0 : i32
    %c0_i32_1 = arith.constant 0 : i32
    return %arg1, %c0_i32, %c0_i32_0 : i32, i32, i32
  }
  func.func @transform_12(%arg0: i32, %arg1: i32) -> (i32, i32, i32) {
    %c0_i32 = arith.constant 0 : i32
    %c0_i32_0 = arith.constant 0 : i32
    %c0_i32_1 = arith.constant 0 : i32
    return %arg1, %c0_i32, %c0_i32_0 : i32, i32, i32
  }
  func.func @transform_13(%arg0: i32, %arg1: i32) -> (i32, i32, i32) {
    %c0_i32 = arith.constant 0 : i32
    %c0_i32_0 = arith.constant 0 : i32
    %c0_i32_1 = arith.constant 0 : i32
    return %arg1, %c0_i32, %c0_i32_0 : i32, i32, i32
  }
  func.func @transform_14(%arg0: i32, %arg1: i32) -> (i32, i32, i32) {
    %c0_i32 = arith.constant 0 : i32
    %c0_i32_0 = arith.constant 0 : i32
    %c0_i32_1 = arith.constant 0 : i32
    return %arg0, %c0_i32, %c0_i32_0 : i32, i32, i32
  }
}

</mosaic_0001>

<bundles_post_ra>
// kernel: tpu_custom_call.1
= control target key start
LH: loop header
LB: loop body
LE: loop exit
PB: predicated region body
PF: predicated region fallthrough
CT: control target
= control target key end

     0   :  { %s3206_s0 = inlined_call_operand.vmem [shape: f32[2,8,32], index: 0, kind: input, shape index: {}]   ;;  %s3207_s1 = inlined_call_operand.vmem [shape: f32[2,1,8], index: 1, kind: input, shape index: {}]   ;;  %s3208_s2 = inlined_call_operand.vmem [shape: f32[2,1,32], index: 2, kind: input, shape index: {}]   ;;  %s3209_s3 = inlined_call_operand.vmem [shape: f32[2,1,32], index: 3, kind: input, shape index: {}]   ;;  %s3210_s4 = inlined_call_operand.vmem [shape: bf16[2,32,96], index: 4, kind: input, shape index: {}]   ;;  %s3211_s5 = inlined_call_operand.vmem [shape: f32[2,1,96], index: 5, kind: input, shape index: {}]   ;;  %s3212_s6 = inlined_call_operand.vmem [shape: bf16[2,32,32], index: 6, kind: input, shape index: {}]   ;;  %s3213_s7 = inlined_call_operand.vmem [shape: f32[2,1,32], index: 7, kind: input, shape index: {}]   ;;  %s3214_s8 = inlined_call_operand.vmem [shape: f32[2,1,32], index: 8, kind: input, shape index: {}]   ;;  %s3215_s9 = inlined_call_operand.vmem [shape: f32[2,1,32], index: 9, kind: input, shape index: {}]   ;;  %s3216_s10 = inlined_call_operand.vmem [shape: bf16[2,32,128], index: 10, kind: input, shape index: {}]   ;;  %s3217_s11 = inlined_call_operand.vmem [shape: f32[2,1,128], index: 11, kind: input, shape index: {}]   ;;  %s3218_s12 = inlined_call_operand.vmem [shape: bf16[2,128,32], index: 12, kind: input, shape index: {}]   ;;  %s3219_s13 = inlined_call_operand.vmem [shape: f32[2,1,32], index: 13, kind: input, shape index: {}]   ;;  %s3220_s14 = inlined_call_operand.hbm [shape: f32[2,8,32], index: 14, kind: output, shape index: {}]  }
   0x1   :  { %3226 = sst [smem:[#allocation10_spill]] %s3207_s1 }
   0x2   :  { %3227 = sst [smem:[#allocation11_spill]] %s3210_s4 }
   0x3   :  { %3228 = sst [smem:[#allocation12_spill]] %s3212_s6 }
   0x4   :  { %3229 = sst [smem:[#allocation13_spill]] %s3220_s14 }
   0x5   :  { %19 = vsyncpa [#allocation4], 0  ;;  %s2810_s29 = smov 0   ;;  %s2812_s30 = smov 0  }
   0x6   :  { %s2814_s15 = smov 0  }
   0x7 LB: > { %3230 = sst [smem:[#allocation6_spill]] %s2710_s30  ;;  %s34_s17 = sadd.s32 1, %s2710_s30  ;;  %s2714_s15 = sphi %s2814_s15, %s25_s15   ;;  %s2710_s30 = sphi %s2812_s30, %s3248_s30   ;;  %s2706_s29 = sphi %s2810_s29, %s3247_s29  }
   0x8   : > { %3231 = sst [smem:[#allocation7_spill]] %s2714_s15  ;;  %p35_p0 = scmp.ge.s32.totalorder %s34_s17, 2 }
   0x9   : > { %p2288_p1 = scmp.ge.s32.totalorder %s2714_s15, 1  ;;  %p540_p2 = scmp.lt.s32.totalorder %s2714_s15, 3 }
   0xa   : > { %s3250_s17 = smov (%p35_p0, %s34_s17), 0 }
   0xb   : > { %3232 = sst [smem:[#allocation8_spill]] %s3250_s17  ;;  %p541_p3 = pnand %p2288_p1, %p540_p2 }
   0xd   : > { %544 = sbr.rel (%p541_p3) target bundleno = 4221 (0x107d), region = 76 }
  0x14   : > { %p640_p4 = scmp.lt.s32.totalorder %s2706_s29, 1  ;;  %s3233_s4 = sld [smem:[#allocation11_spill]] }
  0x15   : > { %s3234_s6 = sld [smem:[#allocation12_spill]]  ;;  %p2297_p5 = scmp.ne.s32.totalorder %s2706_s29, 0 }
  0x16   : > { %s2833_s18 = scalar_select %p640_p4, %s2706_s29, 1 }
  0x17   : > { %689 = sbr.rel (%p2297_p5) target bundleno = 30 (0x1e), region = 80  ;;  %v690_v0 = vld [vmem:[%s3206_s0] sm:$0xff] (!%p2297_p5)  ;;  %vm692_vm0 = vcmask (!%p2297_p5), 261120   ;;  %v691_v1 = vld [vmem:[%s3206_s0 + $0x8] sm:$0xff] (!%p2297_p5) }
  0x18   : > { %s2346_s25 = sshll.u32 %s2833_s18, 4  ;;  %s664_s1 = scalar_lea.vmem %s3214_s8, %s2833_s18  ;;  %693 = vst.msk [vmem:[#allocation2] sm:$0xff] (!%p2297_p5), %vm692_vm0, %v690_v0  ;;  %694 = vst.msk [vmem:[#allocation2 + $0x8] sm:$0xff] (!%p2297_p5), %vm692_vm0, %v691_v1 }
  0x19   : > { %s667_s28 = scalar_lea.vmem %s3215_s9, %s2833_s18  ;;  %s683_s26 = scalar_lea.vmem %s3219_s13, %s2833_s18 }
  0x1a   : > { %s2851_s16 = scalar_lea.vmem %s3233_s4, %s2346_s25  ;;  %s2873_s4 = scalar_lea.vmem %s3216_s10, %s2346_s25 }
  0x1b   : > { %s2856_s14 = scalar_lea.vmem %s3234_s6, %s2346_s25  ;;  %s675_s6 = scalar_lea.vmem %s3217_s11, %s2833_s18 }
  0x1c   : > { %3235 = sst [smem:[#allocation9_spill]] %s2856_s14  ;;  %s2349_s14 = sshll.u32 %s2833_s18, 6 }
  0x1d   : > { %s2883_s22 = scalar_lea.vmem %s3218_s12, %s2349_s14 }
  0x1e PF: > { %vm699_vm1 = vcmask 261120   ;;  %v2604_v16 = vld [vmem:[%s2851_s16] sm:$0xff]   ;;  %v2716_v17 = vmov 0.0   ;;  %v2605_v18 = vld [vmem:[%s2851_s16 + $0x8] sm:$0xff]   ;;  %vm2717_vm2 = vmmov 0   ;;  %s3236_s30 = scalar_lea.vmem %s3208_s2, %s2833_s18  ;;  %s3237_s21 = scalar_lea.vmem %s3209_s3, %s2833_s18  ;;  %vm838_vm3 = vcmask 64512  }
  0x1f   : > { %v2896_v2 = vld [vmem:[#allocation2] sm:$0xff]  ;;  %v2898_v3 = vld [vmem:[#allocation2 + $0x8] sm:$0xff]  ;;  %2400 = vmatprep.subr.bf16.mxu0 %v2716_v17  ;;  %2420 = vmatprep.subr.bf16.mxu1 %v2716_v17  ;;  %s3238_s27 = scalar_lea.vmem %s3211_s5, %s2833_s18  ;;  %s2718_s25 = smov 96   ;;  %v813_v49 = vlaneseq  ;;  %v2719_v52 = vmov -1e+09   ;;  %vm967_vm5 = vcmask 1043456  }
  0x20   : > { %v700_v4 = vsel %vm699_vm1, %v2896_v2, 0.0  ;;  %v703_v5 = vsel %vm699_vm1, %v2898_v3, 0.0  ;;  %2401 = vmatpush3.bf16.msra.mxu0 %v2604_v16  ;;  %2404 = vmatprep.mubr.msk.bf16.mxu0 %vm2717_vm2, %v2716_v17  ;;  %v2298_v27 = vld [vmem:[%s3236_s30] ss:$0 sm:$0xff]  ;;  %s3239_s14 = sld [smem:[#allocation10_spill]]  ;;  %s2720_s17 = smov 64  }
  0x21   : > { %701 = vadd.xlane.f32.xlu0 %v700_v4  ;;  %2402 = vmatprep.subr.bf16.mxu0 %v2716_v17  ;;  %v2299_v31 = vld [vmem:[%s3237_s21] ss:$0 sm:$0xff]  ;;  %v814_v50 = vshrl.u32 %v813_v49, 7  ;;  %v816_v51 = vand.u32 127, %v813_v49  ;;  %s2721_s15 = smov 88   ;;  %s2722_s21 = smov 120  }
  0x22   : > { %2422 = vmatprep.mubr.msk.bf16.mxu1 %vm2717_vm2, %v2716_v17  ;;  %v2300_v36 = vld [vmem:[%s3238_s27] ss:$0 sm:$0xff]  ;;  %s2723_s24 = smov 56   ;;  %s2724_s23 = smov 80   ;;  %vm1757_vm6 = vcmask 130048   ;;  %vm1760_vm7 = vcmask 195584  }
  0x23   : > { %vm817_vm4 = vcmp.le.s32.totalorder %v816_v51, %v814_v50  ;;  %s2725_s27 = smov 112   ;;  %s2727_s19 = smov 72  }
  0x24   : > { %2403 = vmatpush3.bf16.msra.mxu0 %v2605_v18  ;;  %v818_v53 = vsel %vm817_vm4, 0.0, %v2719_v52  ;;  %s2728_s20 = smov 104   ;;  %s2729_s16 = smov 40  }
  0x25   : > { %704 = vadd.xlane.f32.xlu0 %v703_v5  ;;  %2408 = vmatprep.subr.bf16.mxu0 %v2716_v17  ;;  %s2730_s30 = smov 8   ;;  %p2341_p6 = scmp.ne.s32.totalorder %s2706_s29, 1 }
  0x26   : > { %v2304_v54 = vld [vmem:[%s3239_s14] ss:$0 sm:$0xff]  ;;  %v2305_v62 = vld [vmem:[%s3239_s14 + $0x1] ss:$0 sm:$0xff] }
  0x27   : > { %v2957_v55 = vadd.f32 %v2304_v54, %v818_v53  ;;  %v2964_v0 = vadd.f32 %v2305_v62, %v818_v53 }
  0xae   : > { %v702_v6 = vpop.xlane.xlu0 %701 }
  0xaf   : > { %v707_v7 = vmul.f32 0.03125, %v702_v6 }
  0xb1   : > { %v709_v8 = vsub.f32 %v2896_v2, %v707_v7 }
  0xb2   : > { %v705_v9 = vpop.xlane.xlu0 %704 }
  0xb3   : > { %v708_v10 = vmul.f32 0.03125, %v705_v9  ;;  %v711_v11 = vmul.f32 %v709_v8, %v709_v8 }
  0xb5   : > { %v710_v12 = vsub.f32 %v2898_v3, %v708_v10  ;;  %v713_v13 = vsel %vm699_vm1, %v711_v11, 0.0 }
  0xb6   : > { %714 = vadd.xlane.f32.xlu1 %v713_v13 }
  0xb7   : > { %v712_v14 = vmul.f32 %v710_v12, %v710_v12 }
  0xb9   : > { %v716_v15 = vsel %vm699_vm1, %v712_v14, 0.0 }
  0xba   : > { %717 = vadd.xlane.f32.xlu1 %v716_v15 }
 0x143   : > { %v715_v19 = vpop.xlane.xlu1 %714 }
 0x144   : > { %v719_v20 = vmul.f32 0.03125, %v715_v19 }
 0x146   : > { %v721_v21 = vadd.f32 1e-05, %v719_v20 }
 0x147   : > { %v718_v22 = vpop.xlane.xlu1 %717 }
 0x148   : > { %2618 = vrsqrt.f32 %v721_v21  ;;  %v720_v23 = vmul.f32 0.03125, %v718_v22 }
 0x14a   : > { %v722_v24 = vadd.f32 1e-05, %v720_v23 }
 0x14c   : > { %2620 = vrsqrt.f32 %v722_v24 }
 0x152   : > { %v2619_v25 = vpop.eup %2618 }
 0x153   : > { %v725_v26 = vmul.f32 %v2619_v25, %v709_v8 }
 0x155   : > { %v733_v30 = vmul.f32 %v2298_v27, %v725_v26 }
 0x156   : > { %v2621_v28 = vpop.eup %2620 }
 0x157   : > { %v726_v29 = vmul.f32 %v2621_v28, %v710_v12  ;;  %v741_v33 = vadd.f32 %v2299_v31, %v733_v30 }
 0x159   : > { %v734_v32 = vmul.f32 %v2298_v27, %v726_v29 }
 0x15b   : > { %v742_v34 = vadd.f32 %v2299_v31, %v734_v32 }
 0x15d   : > { %v743_v35 = vpack.c.bf16 %v742_v34, %v741_v33 }
 0x15f   : > { %2405 = vmatmul.mubr.msk.bf16.vlgmr.msra.gmra.mrb[0].mxu0 %vm699_vm1, %v743_v35 }
 0x160   : > { %2410 = vmatprep.mubr.msk.bf16.mxu0 %vm2717_vm2, %v2716_v17 }
 0x232   : > { %v804_v37 = vpop.f32.mrb[0].mxu0 }
 0x233   : > { %v805_v38 = vadd.f32 %v2300_v36, %v804_v37  ;;  %v2406_v39 = vpop.f32.mrb[1].mxu0 }
 0x234   : > { %v807_v40 = vpop.f32.mrb[2].mxu0 }
 0x235   : > { %v2936_v41 = vpack.c.bf16 %v805_v38, %v805_v38  ;;  %v808_v42 = vadd.f32 %v2300_v36, %v807_v40  ;;  %v2407_v43 = vpop.f32.mrb[3].mxu0 }
 0x237   : > { %v2938_v44 = vpack.c.bf16 %v808_v42, %v808_v42  ;;  %836 = vrot.lane.b32.xlu0 %v2936_v41, %s2718_s25 }
 0x239   : > { %886 = vrot.lane.b32.xlu1 %v2938_v44, %s2718_s25  ;;  %s2726_s25 = smov 48  }
 0x2a9   : > { %v837_v45 = vpop.permute.xlu0 %836 }
 0x2aa   : > { %v843_v46 = vsel %vm838_vm3, %v837_v45, 0 }
 0x2ab   : > { %2409 = vmatpush3.bf16.xpose.msra.mxu0 %v843_v46  ;;  %v887_v47 = vpop.permute.xlu1 %886 }
 0x2ac   : > { %2414 = vmatprep.subr.bf16.mxu0 %v2716_v17  ;;  %v892_v48 = vsel %vm838_vm3, %v887_v47, 0 }
 0x2b2   : > { %2411 = vmatmul.mubr.msk.bf16.vlgmr.msra.gmra.mrb[4].mxu0 %vm838_vm3, %v2936_v41 }
 0x2b3   : > { %2415 = vmatpush3.bf16.xpose.msra.mxu0 %v892_v48  ;;  %2416 = vmatprep.mubr.msk.bf16.mxu0 %vm2717_vm2, %v2716_v17 }
 0x2b4   : > { %2426 = vmatprep.subr.bf16.mxu0 %v2716_v17 }
 0x2ba   : > { %2417 = vmatmul.mubr.msk.bf16.vlgmr.msra.gmra.mrb[8].mxu0 %vm838_vm3, %v2938_v44 }
 0x2bb   : > { %2428 = vmatprep.mubr.msk.bf16.mxu0 %vm2717_vm2, %v2716_v17 }
 0x385   : > { %v879_v56 = vpop.f32.mrb[4].mxu0 }
 0x386   : > { %v934_v57 = vmul.f32 0.35355338, %v879_v56  ;;  %v2412_v58 = vpop.f32.mrb[5].mxu0 }
 0x387   : > { %v882_v59 = vpop.f32.mrb[6].mxu0 }
 0x388   : > { %v2413_v60 = vpop.f32.mrb[7].mxu0  ;;  %v936_v61 = vadd.f32 %v934_v57, %v2957_v55 }
 0x38a   : > { %v938_v63 = vsel %vm838_vm3, %v936_v61, -inf }
 0x38b   : > { %939 = vmax.xlane.f32.xlu1 %v938_v63 }
 0x38d   : > { %v928_v1 = vpop.f32.mrb[8].mxu0 }
 0x38e   : > { %v935_v4 = vmul.f32 0.35355338, %v928_v1  ;;  %v2418_v5 = vpop.f32.mrb[9].mxu0 }
 0x38f   : > { %v931_v6 = vpop.f32.mrb[10].mxu0 }
 0x390   : > { %v2419_v7 = vpop.f32.mrb[11].mxu0  ;;  %v937_v8 = vadd.f32 %v935_v4, %v2964_v0 }
 0x392   : > { %v941_v9 = vsel %vm838_vm3, %v937_v8, -inf }
 0x393   : > { %942 = vmax.xlane.f32.xlu0 %v941_v9 }
 0x39c   : > { %1011 = vrot.lane.b32.xlu1 %v2938_v44, %s2720_s17 }
 0x3a0   : > { %1061 = vrot.lane.b32.xlu1 %v2936_v41, %s2721_s15 }
 0x418   : > { %v940_v10 = vpop.xlane.xlu1 %939 }
 0x419   : > { %v944_v11 = vsub.f32 %v936_v61, %v940_v10 }
 0x41b   : > { %v946_v12 = vmul.f32 1.442695, %v944_v11 }
 0x41c   : > { %v1012_v13 = vpop.permute.xlu1 %1011 }
 0x41d   : > { %2622 = vpow2.f32 %v946_v12  ;;  %v1017_v14 = vsel %vm967_vm5, %v1012_v13, 0 }
 0x41e   : > { %2427 = vmatpush3.bf16.msra.mxu0 %v1017_v14 }
 0x41f   : > { %2438 = vmatprep.subr.bf16.mxu0 %v2716_v17 }
 0x420   : > { %v943_v15 = vpop.xlane.xlu0 %942  ;;  %v1062_v24 = vpop.permute.xlu1 %1061 }
 0x421   : > { %v945_v16 = vsub.f32 %v937_v8, %v943_v15  ;;  %v1067_v31 = vsel %vm838_vm3, %v1062_v24, 0 }
 0x423   : > { %v948_v18 = vmul.f32 1.442695, %v945_v16 }
 0x425   : > { %2624 = vpow2.f32 %v948_v18 }
 0x427   : > { %v2623_v19 = vpop.eup %2622 }
 0x428   : > { %v950_v20 = vsel %vm838_vm3, %v2623_v19, 0.0 }
 0x429   : > { %951 = vadd.xlane.f32.xlu0 %v950_v20 }
 0x42f   : > { %v2625_v21 = vpop.eup %2624 }
 0x430   : > { %v953_v22 = vsel %vm838_vm3, %v2625_v21, 0.0 }
 0x431   : > { %954 = vadd.xlane.f32.xlu1 %v953_v22 }
 0x43f   : > { %962 = vrot.lane.b32.xlu0 %v2936_v41, %s2720_s17  ;;  %s2731_s17 = smov 16  }
 0x442   : > { %1111 = vrot.lane.b32.xlu1 %v2938_v44, %s2721_s15  ;;  %s3240_s15 = sld [smem:[#allocation9_spill]] }
 0x443   : > { %1059 = vrot.lane.b32.xlu0 %v2936_v41, %s2722_s21 }
 0x446   : > { %1109 = vrot.lane.b32.xlu1 %v2938_v44, %s2722_s21  ;;  %s2732_s21 = smov 24  }
 0x4b6   : > { %v952_v23 = vpop.xlane.xlu0 %951 }
 0x4b7   : > { %2626 = vrcp.f32 %v952_v23 }
 0x4ba   : > { %v963_v25 = vpop.permute.xlu0 %962 }
 0x4bb   : > { %v969_v26 = vsel %vm967_vm5, %v963_v25, 0 }
 0x4bc   : > { %2421 = vmatpush3.bf16.msra.mxu1 %v969_v26 }
 0x4bd   : > { %2432 = vmatprep.subr.bf16.mxu1 %v2716_v17 }
 0x4be   : > { %v955_v27 = vpop.xlane.xlu1 %954  ;;  %v1060_v36 = vpop.permute.xlu0 %1059 }
 0x4bf   : > { %2628 = vrcp.f32 %v955_v27 }
 0x4c1   : > { %v2627_v28 = vpop.eup %2626 }
 0x4c2   : > { %v958_v29 = vmul.f32 %v2627_v28, %v2623_v19  ;;  %v1112_v34 = vpop.permute.xlu1 %1111 }
 0x4c3   : > { %v1117_v37 = vsel %vm838_vm3, %v1112_v34, 0 }
 0x4c4   : > { %v960_v30 = vpack.c.bf16 %v958_v29, %v958_v29 }
 0x4c6   : > { %2423 = vmatmul.mubr.msk.bf16.vlgmr.msra.gmra.mrb[0].mxu1 %vm838_vm3, %v960_v30  ;;  %v1110_v38 = vpop.permute.xlu1 %1109 }
 0x4c7   : > { %2433 = vmatpush3.bf16.xpose.msra.mxu1 %v1067_v31  ;;  %2434 = vmatprep.mubr.msk.bf16.mxu1 %vm2717_vm2, %v2716_v17 }
 0x4c8   : > { %2444 = vmatprep.subr.bf16.mxu1 %v2716_v17 }
 0x4c9   : > { %v2629_v32 = vpop.eup %2628 }
 0x4ca   : > { %v959_v33 = vmul.f32 %v2629_v32, %v2625_v21 }
 0x4cc   : > { %v961_v35 = vpack.c.bf16 %v959_v33, %v959_v33 }
 0x4ce   : > { %2429 = vmatmul.mubr.msk.bf16.vlgmr.msra.gmra.mrb[12].mxu0 %vm838_vm3, %v961_v35  ;;  %2435 = vmatmul.mubr.msk.bf16.vlgmr.msra.gmra.mrb[4].mxu1 %vm838_vm3, %v1060_v36 }
 0x4cf   : > { %2439 = vmatpush3.bf16.xpose.msra.mxu0 %v1117_v37  ;;  %2440 = vmatprep.mubr.msk.bf16.mxu0 %vm2717_vm2, %v2716_v17 }
 0x4d0   : > { %2450 = vmatprep.subr.bf16.mxu0 %v2716_v17  ;;  %2446 = vmatprep.mubr.msk.bf16.mxu1 %vm2717_vm2, %v2716_v17 }
 0x4d6   : > { %2441 = vmatmul.mubr.msk.bf16.vlgmr.msra.gmra.mrb[16].mxu0 %vm838_vm3, %v1110_v38 }
 0x4d7   : > { %2452 = vmatprep.mubr.msk.bf16.mxu0 %vm2717_vm2, %v2716_v17 }
 0x599   : > { %v2996_v39 = vpop.f32.mrb[0].mxu1 }
 0x59a   : > { %v2424_v40 = vpop.f32.mrb[1].mxu1 }
 0x59b   : > { %v1008_v42 = vpop.f32.mrb[2].mxu1 }
 0x59c   : > { %v2425_v43 = vpop.f32.mrb[3].mxu1 }
 0x5a1   : > { %v2998_v45 = vpop.f32.mrb[12].mxu0  ;;  %v1103_v46 = vpop.f32.mrb[4].mxu1 }
 0x5a2   : > { %v1159_v47 = vmul.f32 0.35355338, %v1103_v46  ;;  %v2430_v48 = vpop.f32.mrb[13].mxu0  ;;  %v2436_v49 = vpop.f32.mrb[5].mxu1 }
 0x5a3   : > { %v1056_v50 = vpop.f32.mrb[14].mxu0  ;;  %v1106_v51 = vpop.f32.mrb[6].mxu1 }
 0x5a4   : > { %v2431_v52 = vpop.f32.mrb[15].mxu0  ;;  %v2437_v53 = vpop.f32.mrb[7].mxu1  ;;  %v1161_v54 = vadd.f32 %v1159_v47, %v2957_v55 }
 0x5a6   : > { %v1163_v56 = vsel %vm838_vm3, %v1161_v54, -inf }
 0x5a7   : > { %1164 = vmax.xlane.f32.xlu0 %v1163_v56 }
 0x5a9   : > { %v1153_v57 = vpop.f32.mrb[16].mxu0 }
 0x5aa   : > { %v1160_v58 = vmul.f32 0.35355338, %v1153_v57  ;;  %v2442_v59 = vpop.f32.mrb[17].mxu0 }
 0x5ab   : > { %v1156_v60 = vpop.f32.mrb[18].mxu0 }
 0x5ac   : > { %v2443_v61 = vpop.f32.mrb[19].mxu0  ;;  %v1162_v62 = vadd.f32 %v1160_v58, %v2964_v0 }
 0x5ae   : > { %v1166_v63 = vsel %vm838_vm3, %v1162_v62, -inf }
 0x5af   : > { %1167 = vmax.xlane.f32.xlu1 %v1166_v63 }
 0x5c0   : > { %1235 = vrot.lane.b32.xlu1 %v2938_v44, %s2723_s24 }
 0x5c4   : > { %1285 = vrot.lane.b32.xlu1 %v2936_v41, %s2724_s23 }
 0x5c8   : > { %1335 = vrot.lane.b32.xlu1 %v2938_v44, %s2724_s23 }
 0x5cc   : > { %1333 = vrot.lane.b32.xlu1 %v2938_v44, %s2725_s27 }
 0x634   : > { %v1165_v1 = vpop.xlane.xlu0 %1164 }
 0x635   : > { %v1169_v4 = vsub.f32 %v1161_v54, %v1165_v1 }
 0x637   : > { %v1171_v5 = vmul.f32 1.442695, %v1169_v4 }
 0x639   : > { %2630 = vpow2.f32 %v1171_v5 }
 0x63c   : > { %v1168_v6 = vpop.xlane.xlu1 %1167 }
 0x63d   : > { %v1170_v7 = vsub.f32 %v1162_v62, %v1168_v6 }
 0x63f   : > { %v1173_v8 = vmul.f32 1.442695, %v1170_v7 }
 0x640   : > { %v1236_v9 = vpop.permute.xlu1 %1235 }
 0x641   : > { %2632 = vpow2.f32 %v1173_v8  ;;  %v1241_v10 = vsel %vm967_vm5, %v1236_v9, 0 }
 0x642   : > { %2451 = vmatpush3.bf16.msra.mxu0 %v1241_v10 }
 0x643   : > { %v2631_v11 = vpop.eup %2630  ;;  %2462 = vmatprep.subr.bf16.mxu0 %v2716_v17 }
 0x644   : > { %v1175_v12 = vsel %vm838_vm3, %v2631_v11, 0.0  ;;  %v1286_v23 = vpop.permute.xlu1 %1285 }
 0x645   : > { %1176 = vadd.xlane.f32.xlu0 %v1175_v12  ;;  %v1291_v27 = vsel %vm838_vm3, %v1286_v23, 0 }
 0x648   : > { %v1336_v26 = vpop.permute.xlu1 %1335 }
 0x649   : > { %v1341_v29 = vsel %vm838_vm3, %v1336_v26, 0 }
 0x64b   : > { %v2633_v13 = vpop.eup %2632 }
 0x64c   : > { %v1178_v14 = vsel %vm838_vm3, %v2633_v13, 0.0  ;;  %v1334_v31 = vpop.permute.xlu1 %1333 }
 0x64d   : > { %1179 = vadd.xlane.f32.xlu0 %v1178_v14 }
 0x663   : > { %1187 = vrot.lane.b32.xlu0 %v2936_v41, %s2723_s24 }
 0x667   : > { %1283 = vrot.lane.b32.xlu0 %v2936_v41, %s2725_s27  ;;  %s3241_s27 = scalar_lea.vmem %s3213_s7, %s2833_s18 }
 0x6d2   : > { %v1177_v15 = vpop.xlane.xlu0 %1176 }
 0x6d3   : > { %2634 = vrcp.f32 %v1177_v15 }
 0x6da   : > { %v1180_v16 = vpop.xlane.xlu0 %1179 }
 0x6db   : > { %2636 = vrcp.f32 %v1180_v16 }
 0x6dd   : > { %v2635_v18 = vpop.eup %2634 }
 0x6de   : > { %v1183_v19 = vmul.f32 %v2635_v18, %v2631_v11  ;;  %v1188_v20 = vpop.permute.xlu0 %1187 }
 0x6df   : > { %v1193_v21 = vsel %vm967_vm5, %v1188_v20, 0 }
 0x6e0   : > { %2445 = vmatpush3.bf16.msra.mxu1 %v1193_v21  ;;  %v1185_v22 = vpack.c.bf16 %v1183_v19, %v1183_v19 }
 0x6e1   : > { %2456 = vmatprep.subr.bf16.mxu1 %v2716_v17 }
 0x6e2   : > { %v1284_v30 = vpop.permute.xlu0 %1283 }
 0x6e3   : > { %2447 = vmatmul.mubr.msk.bf16.vlgmr.msra.gmra.mrb[8].mxu1 %vm838_vm3, %v1185_v22 }
 0x6e4   : > { %2458 = vmatprep.mubr.msk.bf16.mxu1 %vm2717_vm2, %v2716_v17 }
 0x6e5   : > { %v2637_v24 = vpop.eup %2636 }
 0x6e6   : > { %v1184_v25 = vmul.f32 %v2637_v24, %v2633_v13 }
 0x6e8   : > { %v1186_v28 = vpack.c.bf16 %v1184_v25, %v1184_v25 }
 0x6e9   : > { %2457 = vmatpush3.bf16.xpose.msra.mxu1 %v1291_v27 }
 0x6ea   : > { %2453 = vmatmul.mubr.msk.bf16.vlgmr.msra.gmra.mrb[20].mxu0 %vm838_vm3, %v1186_v28  ;;  %2468 = vmatprep.subr.bf16.mxu1 %v2716_v17 }
 0x6eb   : > { %2463 = vmatpush3.bf16.xpose.msra.mxu0 %v1341_v29  ;;  %2464 = vmatprep.mubr.msk.bf16.mxu0 %vm2717_vm2, %v2716_v17 }
 0x6ec   : > { %2474 = vmatprep.subr.bf16.mxu0 %v2716_v17 }
 0x6f0   : > { %2459 = vmatmul.mubr.msk.bf16.vlgmr.msra.gmra.mrb[12].mxu1 %vm838_vm3, %v1284_v30 }
 0x6f1   : > { %2470 = vmatprep.mubr.msk.bf16.mxu1 %vm2717_vm2, %v2716_v17 }
 0x6f2   : > { %2465 = vmatmul.mubr.msk.bf16.vlgmr.msra.gmra.mrb[24].mxu0 %vm838_vm3, %v1334_v31 }
 0x6f3   : > { %2476 = vmatprep.mubr.msk.bf16.mxu0 %vm2717_vm2, %v2716_v17 }
 0x7b6   : > { %v3032_v32 = vpop.f32.mrb[8].mxu1 }
 0x7b7   : > { %v2448_v33 = vpop.f32.mrb[9].mxu1 }
 0x7b8   : > { %v1232_v34 = vpop.f32.mrb[10].mxu1 }
 0x7b9   : > { %v2449_v35 = vpop.f32.mrb[11].mxu1 }
 0x7bd   : > { %v3034_v36 = vpop.f32.mrb[20].mxu0 }
 0x7be   : > { %v2589_v37 = vpack.i.bf16 %v3034_v36, %v3032_v32  ;;  %v2454_v38 = vpop.f32.mrb[21].mxu0 }
 0x7bf   : > { %v1280_v40 = vpop.f32.mrb[22].mxu0 }
 0x7c0   : > { %v2455_v42 = vpop.f32.mrb[23].mxu0 }
 0x7c3   : > { %v1327_v43 = vpop.f32.mrb[12].mxu1 }
 0x7c4   : > { %v1383_v46 = vmul.f32 0.35355338, %v1327_v43  ;;  %v2460_v47 = vpop.f32.mrb[13].mxu1 }
 0x7c5   : > { %v1330_v48 = vpop.f32.mrb[14].mxu1  ;;  %v1377_v49 = vpop.f32.mrb[24].mxu0 }
 0x7c6   : > { %v1384_v50 = vmul.f32 0.35355338, %v1377_v49  ;;  %v2461_v51 = vpop.f32.mrb[15].mxu1  ;;  %v2466_v52 = vpop.f32.mrb[25].mxu0  ;;  %v1385_v53 = vadd.f32 %v1383_v46, %v2957_v55 }
 0x7c7   : > { %v1380_v54 = vpop.f32.mrb[26].mxu0 }
 0x7c8   : > { %v2467_v56 = vpop.f32.mrb[27].mxu0  ;;  %v1387_v57 = vsel %vm838_vm3, %v1385_v53, -inf  ;;  %v1386_v58 = vadd.f32 %v1384_v50, %v2964_v0 }
 0x7c9   : > { %1388 = vmax.xlane.f32.xlu0 %v1387_v57 }
 0x7ca   : > { %v1390_v59 = vsel %vm838_vm3, %v1386_v58, -inf }
 0x7cb   : > { %1391 = vmax.xlane.f32.xlu1 %v1390_v59 }
 0x7dc   : > { %1459 = vrot.lane.b32.xlu1 %v2938_v44, %s2726_s25 }
 0x7e0   : > { %1509 = vrot.lane.b32.xlu1 %v2936_v41, %s2727_s19 }
 0x7e4   : > { %1559 = vrot.lane.b32.xlu1 %v2938_v44, %s2727_s19 }
 0x7e8   : > { %1557 = vrot.lane.b32.xlu1 %v2938_v44, %s2728_s20 }
 0x856   : > { %v1389_v60 = vpop.xlane.xlu0 %1388 }
 0x857   : > { %v1393_v61 = vsub.f32 %v1385_v53, %v1389_v60 }
 0x858   : > { %v1392_v62 = vpop.xlane.xlu1 %1391 }
 0x859   : > { %v1395_v63 = vmul.f32 1.442695, %v1393_v61  ;;  %v1394_v1 = vsub.f32 %v1386_v58, %v1392_v62 }
 0x85b   : > { %2638 = vpow2.f32 %v1395_v63  ;;  %v1397_v4 = vmul.f32 1.442695, %v1394_v1 }
 0x85c   : > { %v1460_v5 = vpop.permute.xlu1 %1459 }
 0x85d   : > { %2640 = vpow2.f32 %v1397_v4  ;;  %v1465_v6 = vsel %vm967_vm5, %v1460_v5, 0 }
 0x85e   : > { %2475 = vmatpush3.bf16.msra.mxu0 %v1465_v6 }
 0x85f   : > { %2486 = vmatprep.subr.bf16.mxu0 %v2716_v17 }
 0x860   : > { %v1510_v16 = vpop.permute.xlu1 %1509 }
 0x861   : > { %v1515_v23 = vsel %vm838_vm3, %v1510_v16, 0 }
 0x864   : > { %v1560_v22 = vpop.permute.xlu1 %1559 }
 0x865   : > { %v2639_v7 = vpop.eup %2638  ;;  %v1565_v25 = vsel %vm838_vm3, %v1560_v22, 0 }
 0x866   : > { %v1399_v8 = vsel %vm838_vm3, %v2639_v7, 0.0 }
 0x867   : > { %v2641_v9 = vpop.eup %2640  ;;  %1400 = vadd.xlane.f32.xlu0 %v1399_v8 }
 0x868   : > { %v1402_v10 = vsel %vm838_vm3, %v2641_v9, 0.0  ;;  %v1558_v27 = vpop.permute.xlu1 %1557 }
 0x86b   : > { %1403 = vadd.xlane.f32.xlu0 %v1402_v10 }
 0x881   : > { %1411 = vrot.lane.b32.xlu0 %v2936_v41, %s2726_s25 }
 0x885   : > { %1507 = vrot.lane.b32.xlu0 %v2936_v41, %s2728_s20 }
 0x8f4   : > { %v1401_v11 = vpop.xlane.xlu0 %1400 }
 0x8f5   : > { %2642 = vrcp.f32 %v1401_v11 }
 0x8f8   : > { %v1404_v12 = vpop.xlane.xlu0 %1403 }
 0x8f9   : > { %2644 = vrcp.f32 %v1404_v12 }
 0x8fc   : > { %v1412_v13 = vpop.permute.xlu0 %1411 }
 0x8fd   : > { %v1417_v14 = vsel %vm967_vm5, %v1412_v13, 0  ;;  %v2606_v13 = vld [vmem:[%s3240_s15] sm:$0xff]  }
 0x8fe   : > { %2469 = vmatpush3.bf16.msra.mxu1 %v1417_v14  ;;  %v2607_v14 = vld [vmem:[%s3240_s15 + $0x8] sm:$0xff]  }
 0x8ff   : > { %v2643_v15 = vpop.eup %2642  ;;  %2480 = vmatprep.subr.bf16.mxu1 %v2716_v17 }
 0x900   : > { %v1407_v18 = vmul.f32 %v2643_v15, %v2639_v7  ;;  %v1508_v26 = vpop.permute.xlu0 %1507 }
 0x902   : > { %v1409_v19 = vpack.c.bf16 %v1407_v18, %v1407_v18 }
 0x903   : > { %v2645_v20 = vpop.eup %2644 }
 0x904   : > { %v1408_v21 = vmul.f32 %v2645_v20, %v2641_v9  ;;  %2471 = vmatmul.mubr.msk.bf16.vlgmr.msra.gmra.mrb[16].mxu1 %vm838_vm3, %v1409_v19 }
 0x905   : > { %2482 = vmatprep.mubr.msk.bf16.mxu1 %vm2717_vm2, %v2716_v17 }
 0x906   : > { %v1410_v24 = vpack.c.bf16 %v1408_v21, %v1408_v21 }
 0x907   : > { %2481 = vmatpush3.bf16.xpose.msra.mxu1 %v1515_v23 }
 0x908   : > { %2477 = vmatmul.mubr.msk.bf16.vlgmr.msra.gmra.mrb[28].mxu0 %vm838_vm3, %v1410_v24  ;;  %2492 = vmatprep.subr.bf16.mxu1 %v2716_v17 }
 0x909   : > { %2487 = vmatpush3.bf16.xpose.msra.mxu0 %v1565_v25  ;;  %2488 = vmatprep.mubr.msk.bf16.mxu0 %vm2717_vm2, %v2716_v17 }
 0x90a   : > { %2498 = vmatprep.subr.bf16.mxu0 %v2716_v17 }
 0x90e   : > { %2483 = vmatmul.mubr.msk.bf16.vlgmr.msra.gmra.mrb[20].mxu1 %vm838_vm3, %v1508_v26 }
 0x90f   : > { %2494 = vmatprep.mubr.msk.bf16.mxu1 %vm2717_vm2, %v2716_v17 }
 0x910   : > { %2489 = vmatmul.mubr.msk.bf16.vlgmr.msra.gmra.mrb[32].mxu0 %vm838_vm3, %v1558_v27 }
 0x911   : > { %2500 = vmatprep.mubr.msk.bf16.mxu0 %vm2717_vm2, %v2716_v17 }
 0x9d7   : > { %v1453_v28 = vpop.f32.mrb[16].mxu1 }
 0x9d8   : > { %v2472_v29 = vpop.f32.mrb[17].mxu1 }
 0x9d9   : > { %v1456_v30 = vpop.f32.mrb[18].mxu1 }
 0x9da   : > { %v2473_v31 = vpop.f32.mrb[19].mxu1 }
 0x9db   : > { %v1501_v33 = vpop.f32.mrb[28].mxu0 }
 0x9dc   : > { %v2594_v34 = vpack.i.bf16 %v1501_v33, %v1453_v28  ;;  %v2478_v35 = vpop.f32.mrb[29].mxu0 }
 0x9dd   : > { %v1504_v38 = vpop.f32.mrb[30].mxu0 }
 0x9de   : > { %v2479_v40 = vpop.f32.mrb[31].mxu0 }
 0x9e1   : > { %v1551_v42 = vpop.f32.mrb[20].mxu1 }
 0x9e2   : > { %v1607_v43 = vmul.f32 0.35355338, %v1551_v42  ;;  %v2484_v46 = vpop.f32.mrb[21].mxu1 }
 0x9e3   : > { %v1554_v47 = vpop.f32.mrb[22].mxu1  ;;  %v1601_v48 = vpop.f32.mrb[32].mxu0 }
 0x9e4   : > { %v1608_v49 = vmul.f32 0.35355338, %v1601_v48  ;;  %v2485_v50 = vpop.f32.mrb[23].mxu1  ;;  %v2490_v51 = vpop.f32.mrb[33].mxu0  ;;  %v1609_v52 = vadd.f32 %v1607_v43, %v2957_v55 }
 0x9e5   : > { %v1604_v53 = vpop.f32.mrb[34].mxu0 }
 0x9e6   : > { %v2491_v54 = vpop.f32.mrb[35].mxu0  ;;  %v1611_v56 = vsel %vm838_vm3, %v1609_v52, -inf  ;;  %v1610_v57 = vadd.f32 %v1608_v49, %v2964_v0 }
 0x9e7   : > { %1612 = vmax.xlane.f32.xlu0 %v1611_v56 }
 0x9e8   : > { %v1614_v58 = vsel %vm838_vm3, %v1610_v57, -inf }
 0x9e9   : > { %1615 = vmax.xlane.f32.xlu1 %v1614_v58 }
 0x9fa   : > { %1683 = vrot.lane.b32.xlu1 %v2938_v44, %s2729_s16 }
 0x9fe   : > { %2590 = vrot.lane.b32.xlu1 %v2589_v37, %s2730_s30 }
 0xa02   : > { %2595 = vrot.lane.b32.xlu1 %v2594_v34, %s2731_s17 }
 0xa74   : > { %v1613_v55 = vpop.xlane.xlu0 %1612 }
 0xa75   : > { %v1617_v59 = vsub.f32 %v1609_v52, %v1613_v55 }
 0xa76   : > { %v1616_v60 = vpop.xlane.xlu1 %1615 }
 0xa77   : > { %v1619_v61 = vmul.f32 1.442695, %v1617_v59  ;;  %v1618_v0 = vsub.f32 %v1610_v57, %v1616_v60 }
 0xa79   : > { %2646 = vpow2.f32 %v1619_v61  ;;  %v1621_v62 = vmul.f32 1.442695, %v1618_v0 }
 0xa7a   : > { %v1684_v63 = vpop.permute.xlu1 %1683 }
 0xa7b   : > { %2648 = vpow2.f32 %v1621_v62  ;;  %v1689_v1 = vsel %vm967_vm5, %v1684_v63, 0 }
 0xa7c   : > { %2499 = vmatpush3.bf16.msra.mxu0 %v1689_v1  ;;  %v2608_v1 = vld [vmem:[%s2873_s4] sm:$0xff]  }
 0xa7d   : > { %2512 = vmatprep.subr.bf16.mxu0 %v2716_v17 }
 0xa7e   : > { %v2591_v25 = vpop.permute.xlu1 %2590 }
 0xa7f   : > { %v2593_v27 = vunpack.i.h.bf16 %v2591_v25  ;;  %v2592_v28 = vunpack.i.l.bf16 %v2591_v25  ;;  %v2617_v25 = vld [vmem:[%s2883_s22 + $0x38] sm:$0xff]  }
 0xa81   : > { %v1756_v33 = vsel %vm838_vm3, %v2998_v45, %v2593_v27  ;;  %v1755_v34 = vsel %vm838_vm3, %v2996_v39, %v2592_v28  ;;  %v2322_v45 = vld [vmem:[%s3241_s27] ss:$0 sm:$0xff] }
 0xa82   : > { %v2596_v26 = vpop.permute.xlu1 %2595 }
 0xa83   : > { %v2647_v44 = vpop.eup %2646  ;;  %v2598_v29 = vunpack.i.h.bf16 %v2596_v26  ;;  %v2597_v30 = vunpack.i.l.bf16 %v2596_v26  ;;  %v2328_v26 = vld [vmem:[%s675_s6] ss:$0 sm:$0xff] }
 0xa84   : > { %v1623_v32 = vsel %vm838_vm3, %v2647_v44, 0.0 }
 0xa85   : > { %v2649_v36 = vpop.eup %2648  ;;  %1624 = vadd.xlane.f32.xlu0 %v1623_v32  ;;  %v1758_v40 = vsel %vm1757_vm6, %v1755_v34, %v2597_v30  ;;  %v1759_v42 = vsel %vm1757_vm6, %v1756_v33, %v2598_v29 }
 0xa86   : > { %v1626_v37 = vsel %vm838_vm3, %v2649_v36, 0.0 }
 0xa89   : > { %1627 = vadd.xlane.f32.xlu0 %v1626_v37 }
 0xa9f   : > { %1635 = vrot.lane.b32.xlu0 %v2936_v41, %s2729_s16 }
 0xb12   : > { %v1625_v4 = vpop.xlane.xlu0 %1624 }
 0xb13   : > { %2650 = vrcp.f32 %v1625_v4 }
 0xb16   : > { %v1628_v5 = vpop.xlane.xlu0 %1627 }
 0xb17   : > { %2652 = vrcp.f32 %v1628_v5 }
 0xb1a   : > { %v1636_v6 = vpop.permute.xlu0 %1635 }
 0xb1b   : > { %v1641_v7 = vsel %vm967_vm5, %v1636_v6, 0 }
 0xb1c   : > { %2493 = vmatpush3.bf16.msra.mxu1 %v1641_v7 }
 0xb1d   : > { %v2651_v8 = vpop.eup %2650  ;;  %2504 = vmatprep.subr.bf16.mxu1 %v2716_v17 }
 0xb1e   : > { %v1631_v9 = vmul.f32 %v2651_v8, %v2647_v44  ;;  %v2609_v44 = vld [vmem:[%s2873_s4 + $0x8] sm:$0xff]  }
 0xb20   : > { %v1633_v10 = vpack.c.bf16 %v1631_v9, %v1631_v9  ;;  %v2326_v9 = vld [vmem:[%s664_s1] ss:$0 sm:$0xff] }
 0xb21   : > { %v2653_v11 = vpop.eup %2652 }
 0xb22   : > { %v1632_v12 = vmul.f32 %v2653_v11, %v2649_v36  ;;  %2495 = vmatmul.mubr.msk.bf16.vlgmr.msra.gmra.mrb[24].mxu1 %vm838_vm3, %v1633_v10 }
 0xb23   : > { %2508 = vmatprep.mubr.msk.bf16.mxu1 %vm2717_vm2, %v2716_v17  ;;  %2505 = vmatpush3.bf16.msra.mxu1 %v2606_v13 }
 0xb24   : > { %v1634_v41 = vpack.c.bf16 %v1632_v12, %v1632_v12  ;;  %2506 = vmatprep.subr.bf16.mxu1 %v2716_v17 }
 0xb26   : > { %2501 = vmatmul.mubr.msk.bf16.vlgmr.msra.gmra.mrb[36].mxu0 %vm838_vm3, %v1634_v41  ;;  %v2327_v41 = vld [vmem:[%s667_s28] ss:$0 sm:$0xff] }
 0xb27   : > { %2516 = vmatprep.mubr.msk.bf16.mxu0 %vm2717_vm2, %v2716_v17  ;;  %2507 = vmatpush3.bf16.msra.mxu1 %v2607_v14 }
 0xb28   : > { %2520 = vmatprep.subr.bf16.mxu1 %v2716_v17  ;;  %2513 = vmatpush3.bf16.msra.mxu0 %v2608_v1 }
 0xb29   : > { %2514 = vmatprep.subr.bf16.mxu0 %v2716_v17 }
 0xb2c   : > { %2515 = vmatpush3.bf16.msra.mxu0 %v2609_v44 }
 0xbf5   : > { %v1677_v15 = vpop.f32.mrb[24].mxu1 }
 0xbf6   : > { %v2496_v16 = vpop.f32.mrb[25].mxu1 }
 0xbf7   : > { %v1680_v18 = vpop.f32.mrb[26].mxu1 }
 0xbf8   : > { %v2497_v19 = vpop.f32.mrb[27].mxu1  ;;  %v2610_v18 = vld [vmem:[%s2883_s22] sm:$0xff]  }
 0xbf9   : > { %v1725_v20 = vpop.f32.mrb[36].mxu0  ;;  %v2611_v19 = vld [vmem:[%s2883_s22 + $0x8] sm:$0xff]  }
 0xbfa   : > { %v2599_v21 = vpack.i.bf16 %v1725_v20, %v1677_v15  ;;  %v2502_v22 = vpop.f32.mrb[37].mxu0  ;;  %v2612_v20 = vld [vmem:[%s2883_s22 + $0x10] sm:$0xff]  }
 0xbfb   : > { %v1728_v23 = vpop.f32.mrb[38].mxu0  ;;  %v2614_v22 = vld [vmem:[%s2883_s22 + $0x20] sm:$0xff]  }
 0xbfc   : > { %2600 = vrot.lane.b32.xlu0 %v2599_v21, %s2732_s21  ;;  %v2503_v24 = vpop.f32.mrb[39].mxu0  ;;  %v2613_v21 = vld [vmem:[%s2883_s22 + $0x18] sm:$0xff]   ;;  %v2615_v23 = vld [vmem:[%s2883_s22 + $0x28] sm:$0xff]  }
 0xbfd   : > { %v2616_v24 = vld [vmem:[%s2883_s22 + $0x30] sm:$0xff]  }
 0xc6e   : > { %v2601_v31 = vpop.permute.xlu0 %2600 }
 0xc6f   : > { %v2603_v35 = vunpack.i.h.bf16 %v2601_v31  ;;  %v2602_v38 = vunpack.i.l.bf16 %v2601_v31 }
 0xc71   : > { %v1762_v43 = vsel %vm1760_vm7, %v1759_v42, %v2603_v35  ;;  %v1761_v46 = vsel %vm1760_vm7, %v1758_v40, %v2602_v38 }
 0xc72   : > { %v1763_v47 = vpack.c.bf16 %v1762_v43, %v1761_v46 }
 0xc74   : > { %2509 = vmatmul.mubr.msk.bf16.vlgmr.msra.gmra.mrb[28].mxu1 %vm699_vm1, %v1763_v47 }
 0xc75   : > { %2536 = vmatprep.mubr.msk.bf16.mxu1 %vm2717_vm2, %v2716_v17  ;;  %2521 = vmatpush3.bf16.msra.mxu1 %v2610_v18 }
 0xc76   : > { %2522 = vmatprep.subr.bf16.mxu1 %v2716_v17 }
 0xc79   : > { %2523 = vmatpush3.bf16.msra.mxu1 %v2611_v19 }
 0xc7a   : > { %2524 = vmatprep.subr.bf16.mxu1 %v2716_v17 }
 0xc7d   : > { %2525 = vmatpush3.bf16.msra.mxu1 %v2612_v20 }
 0xc7e   : > { %2526 = vmatprep.subr.bf16.mxu1 %v2716_v17 }
 0xc81   : > { %2527 = vmatpush3.bf16.msra.mxu1 %v2613_v21 }
 0xc82   : > { %2528 = vmatprep.subr.bf16.mxu1 %v2716_v17 }
 0xc85   : > { %2529 = vmatpush3.bf16.msra.mxu1 %v2614_v22 }
 0xc86   : > { %2530 = vmatprep.subr.bf16.mxu1 %v2716_v17 }
 0xc89   : > { %2531 = vmatpush3.bf16.msra.mxu1 %v2615_v23 }
 0xc8a   : > { %2532 = vmatprep.subr.bf16.mxu1 %v2716_v17 }
 0xc8d   : > { %2533 = vmatpush3.bf16.msra.mxu1 %v2616_v24 }
 0xc8e   : > { %2534 = vmatprep.subr.bf16.mxu1 %v2716_v17 }
 0xc91   : > { %2535 = vmatpush3.bf16.msra.mxu1 %v2617_v25 }
 0xd47   : > { %v1824_v48 = vpop.f32.mrb[28].mxu1 }
 0xd48   : > { %v1825_v49 = vadd.f32 %v2322_v45, %v1824_v48  ;;  %v2510_v39 = vpop.f32.mrb[29].mxu1 }
 0xd49   : > { %v1827_v50 = vpop.f32.mrb[30].mxu1 }
 0xd4a   : > { %v3109_v51 = vadd.f32 %v1825_v49, %v2896_v2  ;;  %v1828_v52 = vadd.f32 %v2322_v45, %v1827_v50  ;;  %v2511_v53 = vpop.f32.mrb[31].mxu1 }
 0xd4c   : > { %v3112_v54 = vadd.f32 %v1828_v52, %v2898_v3  ;;  %v1835_v56 = vsel %vm699_vm1, %v3109_v51, 0.0 }
 0xd4d   : > { %1836 = vadd.xlane.f32.xlu1 %v1835_v56 }
 0xd4e   : > { %v1838_v57 = vsel %vm699_vm1, %v3112_v54, 0.0 }
 0xd4f   : > { %1839 = vadd.xlane.f32.xlu0 %v1838_v57 }
 0xdda   : > { %v1837_v58 = vpop.xlane.xlu1 %1836 }
 0xddb   : > { %v1841_v55 = vmul.f32 0.03125, %v1837_v58 }
 0xddc   : > { %v1840_v59 = vpop.xlane.xlu0 %1839 }
 0xddd   : > { %v1843_v2 = vsub.f32 %v3109_v51, %v1841_v55  ;;  %v1842_v60 = vmul.f32 0.03125, %v1840_v59  ;;  %v2332_v55 = vld [vmem:[%s683_s26] ss:$0 sm:$0xff] }
 0xddf   : > { %v1844_v61 = vsub.f32 %v3112_v54, %v1842_v60  ;;  %v1845_v3 = vmul.f32 %v1843_v2, %v1843_v2 }
 0xde1   : > { %v1847_v0 = vsel %vm699_vm1, %v1845_v3, 0.0  ;;  %v1846_v62 = vmul.f32 %v1844_v61, %v1844_v61 }
 0xde2   : > { %1848 = vadd.xlane.f32.xlu0 %v1847_v0 }
 0xde3   : > { %v1850_v63 = vsel %vm699_vm1, %v1846_v62, 0.0 }
 0xde6   : > { %1851 = vadd.xlane.f32.xlu0 %v1850_v63 }
 0xe6f   : > { %v1849_v32 = vpop.xlane.xlu0 %1848 }
 0xe70   : > { %v1853_v36 = vmul.f32 0.03125, %v1849_v32 }
 0xe72   : > { %v1855_v37 = vadd.f32 1e-05, %v1853_v36 }
 0xe73   : > { %v1852_v4 = vpop.xlane.xlu0 %1851 }
 0xe74   : > { %2654 = vrsqrt.f32 %v1855_v37  ;;  %v1854_v5 = vmul.f32 0.03125, %v1852_v4 }
 0xe76   : > { %v1856_v6 = vadd.f32 1e-05, %v1854_v5 }
 0xe78   : > { %2656 = vrsqrt.f32 %v1856_v6 }
 0xe7e   : > { %v2655_v7 = vpop.eup %2654 }
 0xe7f   : > { %v1859_v8 = vmul.f32 %v2655_v7, %v1843_v2 }
 0xe81   : > { %v1867_v11 = vmul.f32 %v2326_v9, %v1859_v8 }
 0xe82   : > { %v2657_v10 = vpop.eup %2656 }
 0xe83   : > { %v1860_v12 = vmul.f32 %v2657_v10, %v1844_v61  ;;  %v1875_v14 = vadd.f32 %v2327_v41, %v1867_v11 }
 0xe85   : > { %v1868_v13 = vmul.f32 %v2326_v9, %v1860_v12 }
 0xe87   : > { %v1876_v15 = vadd.f32 %v2327_v41, %v1868_v13 }
 0xe89   : > { %v1877_v16 = vpack.c.bf16 %v1876_v15, %v1875_v14 }
 0xe8b   : > { %2517 = vmatmul.mubr.msk.bf16.vlgmr.msra.gmra.mrb[40].mxu0 %vm699_vm1, %v1877_v16 }
 0xf5e   : > { %v1938_v27 = vpop.f32.mrb[40].mxu0 }
 0xf5f   : > { %v1939_v28 = vadd.f32 %v2328_v26, %v1938_v27  ;;  %v2518_v29 = vpop.f32.mrb[41].mxu0 }
 0xf60   : > { %v1941_v30 = vpop.f32.mrb[42].mxu0 }
 0xf61   : > { %v1947_v31 = vmul.f32 0.044715, %v1939_v28  ;;  %v1942_v33 = vadd.f32 %v2328_v26, %v1941_v30  ;;  %v2519_v34 = vpop.f32.mrb[43].mxu0  ;;  %v1945_v50 = vmul.f32 0.5, %v1939_v28 }
 0xf63   : > { %v1949_v35 = vmul.f32 %v1947_v31, %v1939_v28  ;;  %v1948_v38 = vmul.f32 0.044715, %v1942_v33  ;;  %v1946_v52 = vmul.f32 0.5, %v1942_v33 }
 0xf65   : > { %v1951_v40 = vmul.f32 %v1949_v35, %v1939_v28  ;;  %v1950_v42 = vmul.f32 %v1948_v38, %v1942_v33 }
 0xf67   : > { %v1953_v43 = vadd.f32 %v1951_v40, %v1939_v28  ;;  %v1952_v46 = vmul.f32 %v1950_v42, %v1942_v33 }
 0xf69   : > { %v1955_v17 = vmul.f32 0.7978846, %v1953_v43  ;;  %v1954_v47 = vadd.f32 %v1952_v46, %v1942_v33 }
 0xf6b   : > { %2658 = vtanh.f32 %v1955_v17  ;;  %v1956_v45 = vmul.f32 0.7978846, %v1954_v47 }
 0xf6d   : > { %2660 = vtanh.f32 %v1956_v45 }
 0xf75   : > { %v2659_v48 = vpop.eup %2658 }
 0xf76   : > { %v1959_v49 = vadd.f32 1.0, %v2659_v48 }
 0xf77   : > { %v2661_v39 = vpop.eup %2660 }
 0xf78   : > { %v1960_v53 = vadd.f32 1.0, %v2661_v39  ;;  %v1961_v56 = vmul.f32 %v1959_v49, %v1945_v50 }
 0xf7a   : > { %v1962_v57 = vmul.f32 %v1960_v53, %v1946_v52 }
 0xf7c   : > { %v1963_v58 = vpack.c.bf16 %v1962_v57, %v1961_v56 }
 0xf7e   : > { %2537 = vmatmul.mubr.bf16.vlgmr.msra.gmra.mrb[32].mxu1 %v1963_v58 }
0x1051   : > { %v2069_v59 = vpop.f32.mrb[32].mxu1 }
0x1052   : > { %v2070_v2 = vadd.f32 %v2332_v55, %v2069_v59  ;;  %v2538_v60 = vpop.f32.mrb[33].mxu1  ;;  %2083 = sbr.rel (%p2341_p6) target bundleno = 4185 (0x1059), region = 84 }
0x1053   : > { %v2072_v61 = vpop.f32.mrb[34].mxu1 }
0x1054   : > { %v2076_v3 = vadd.f32 %v2070_v2, %v3109_v51  ;;  %v2073_v0 = vadd.f32 %v2332_v55, %v2072_v61  ;;  %v2539_v62 = vpop.f32.mrb[35].mxu1 }
0x1056   : > { %2078 = vst.msk [vmem:[#allocation2] sm:$0xff] %vm699_vm1, %v2076_v3  ;;  %v2077_v63 = vadd.f32 %v2073_v0, %v3112_v54  ;;  %2084 = vst.msk [vmem:[#allocation3] sm:$0xff] (!%p2341_p6), %vm699_vm1, %v2076_v3 }
0x1058   : > { %2079 = vst.msk [vmem:[#allocation2 + $0x8] sm:$0xff] %vm699_vm1, %v2077_v63  ;;  %2085 = vst.msk [vmem:[#allocation3 + $0x8] sm:$0xff] (!%p2341_p6), %vm699_vm1, %v2077_v63 }
0x1059 PF: > { %s3242_s18 = sld [smem:[#allocation7_spill]]  ;;  %s2733_s17 = smov [#allocation3]  }
0x105a   : > { %s2095_s15 = sshll.u32 %s2733_s17, 4  ;;  %s2096_s15 = int_to_ptr.vmem [resolvable:$true] %s2095_s15 }
0x105b   : > { %s2662_s21 = scalar_lea.vmem %s2096_s15, 256  ;;  %p2669_p11 = scmp.lt.s32.totalorder %s2096_s15, %s2096_s15 }
0x105c   : > { %p2663_p8 = scmp.ne.s32.totalorder %s2096_s15, %s2662_s21  ;;  %p2670_p12 = scmp.lt.s32.totalorder %s2662_s21, %s2662_s21 }
0x105e   : > { %p2671_p13 = por %p2670_p12, %p2669_p11 }
0x105f   : > { %s3243_s26 = sadd.s32 4294967295, %s3242_s18  }
0x1060   : > { %p3170_p7 = scmp.eq.s32.totalorder %s3243_s26, 1 }
0x1062   : > { %p2664_p9 = pnand %p2663_p8, %p3170_p7 }
0x1064   : > { %p2665_p10 = pneg %p2664_p9 }
0x1066   : > { %p2672_p0 = pnand %p2671_p13, %p2665_p10 }
0x1068   : > { %2675 = shalt.err (!%p2672_p0)
}
0x1069   : > { %s3245_s23 = sld [smem:[#allocation13_spill]] }
0x106f   : > { %s2676_s27 = scalar_lea.hbm %s3245_s23, 256 }
0x1070   : > { %p2677_p1 = scmp.ne.s32.totalorder %s3245_s23, %s2676_s27  ;;  %p2682_p4 = scmp.lt.u32.totalorder %s2676_s27, %s3245_s23 }
0x1072   : > { %p2678_p2 = pnand %p2677_p1, %p3170_p7 }
0x1074   : > { %p2679_p3 = pneg %p2678_p2 }
0x1076   : > { %p2684_p5 = pnand %p2682_p4, %p2679_p3 }
0x1078   : > { %2687 = shalt.err (!%p2684_p5)
}
0x1079   : > { %s2734_s1 = smov 128  }
0x107a   : > { %2541 = dma.vmem_to_hbm [thread:$0]  (%p3170_p7), %s2096_s15, 256, %s3245_s23, [#allocation4], %s2734_s1, %s2734_s1, %s2730_s30  }
0x107b   : > { %2701 = dma.done.wait (%p3170_p7), [#allocation4], 256  }
0x107c   : > { %2703 = vsyncadd (%p3170_p7), [#allocation4], 4294967040 }
0x107d PF: > { %s3246_s22 = sld [smem:[#allocation7_spill]]  ;;  %s3247_s29 = sld [smem:[#allocation6_spill]] }
0x107e   : > { %s3248_s30 = sld [smem:[#allocation8_spill]] }
0x1083   : > { %s25_s15 = sadd.s32 1, %s3246_s22  }
0x1084   : > { %p22_p6 = scmp.ge.s32.totalorder %s25_s15, 4  }
0x1086   :  { %24 = sbr.rel (!%p22_p6) target bundleno = 7 (0x7), region = 151 }
0x108d   :  { %2111 = vsyncpa [#allocation4], 1 }
0x108e   :  { %2113 = vsyncpa [#allocation4 + $0x1], 1 }

</bundles_post_ra>
